<compile_context>
chip_gen: v5e
topology: v5e:2x2
jax: 0.10.0
libtpu: 0.0.40
codegen_flags: <defaults>
</compile_context>

<pallas_src>
import functools

import jax
import jax.numpy as jnp
from jax.experimental import pallas as pl
from jax.experimental.pallas import tpu as pltpu


def _round_up(x, m):
    return (x + m - 1) // m * m


def _make_scnn_kernel(n_convs, tb, l_pad, kn_pad, out_pad):
    def kernel(*refs):
        im_refs = refs[0:n_convs]                  # (TB, L_pad, K*E)  mxu dtype
        w_refs = refs[n_convs:2 * n_convs]         # (K*E, KN_pad)     mxu dtype
        b_refs = refs[2 * n_convs:3 * n_convs]     # (1, KN_pad)       f32
        fcw_refs = refs[3 * n_convs:4 * n_convs]   # (KN_pad, OUT_pad) f32
        fcb_ref = refs[4 * n_convs]                # (1, OUT_pad)      f32
        out_ref = refs[4 * n_convs + 1]            # (TB, OUT_pad)     f32

        acc = jnp.zeros((tb, out_pad), jnp.float32)
        for i in range(n_convs):
            im = im_refs[i][...]                   # (TB, L_pad, CK)
            ck = im.shape[-1]
            # layout-free collapse: L_pad % 8 == 0, last dim unchanged
            lhs = im.reshape(tb * l_pad, ck)
            conv = jnp.dot(lhs, w_refs[i][...],
                           preferred_element_type=jnp.float32)   # (TB*L_pad, KN_pad)
            conv = conv.reshape(tb, l_pad, kn_pad) + b_refs[i][...]
            conv = jnp.maximum(conv, 0.0)                         # bias + ReLU
            feat = jnp.max(conv, axis=1)                          # global max-pool
            # partial linear against this conv width's fc columns (no concat)
            acc = acc + jnp.dot(feat, fcw_refs[i][...],
                                preferred_element_type=jnp.float32)
        out_ref[...] = acc + fcb_ref[...]
    return kernel


@functools.partial(
    jax.jit,
    static_argnames=("kernel_sizes", "training", "block_batch", "mxu_dtype"))
def scnn_forward(data, params, eps=None, *, kernel_sizes, training=False,
                 block_batch=8, mxu_dtype=jnp.bfloat16):
    embed_table = params["embed"]          # (V, E)
    conv_ws = params["conv_w"]             # list of (K, E, KN)
    conv_bs = params["conv_b"]             # list of (1, KN)
    fc_mu = params["fc_mu"]                # (OUT, F)
    fc_sigma = params["fc_sigma"]          # (OUT, F)
    fc_bias = params["fc_bias"]            # (1, OUT)

    B, S = data.shape
    E = embed_table.shape[1]
    KN = conv_ws[0].shape[2]
    OUT = fc_mu.shape[0]
    n = len(kernel_sizes)
    assert fc_mu.shape[1] == n * KN

    KN_pad = _round_up(KN, 128)            # 200 -> 256: lane-aligned feature blocks
    OUT_pad = _round_up(OUT, 128)          # 64  -> 128: lane-dense output stores
    TB = min(_round_up(B, 8), _round_up(block_batch, 8))
    B_pad = _round_up(B, TB)
    L_pad = _round_up(S - min(kernel_sizes) + 1, 8)

    # ---- hoisted reparameterization (computed ONCE, not per grid step) ----
    if training and eps is not None:
        fc_w = fc_mu + jax.nn.softplus(fc_sigma - 2.0) * eps
    else:
        fc_w = fc_mu                        # eval: F.linear(x, fc_mu, fc_bias)

    # Split fc_w into one (KN_pad, OUT_pad) chunk per conv width (transposed).
    fcw_chunks = []
    for i in range(n):
        c = fc_w[:, i * KN:(i + 1) * KN].T                        # (KN, OUT)
        c = jnp.pad(c, ((0, KN_pad - KN), (0, OUT_pad - OUT)))
        fcw_chunks.append(c.astype(jnp.float32))
    fcb = jnp.pad(fc_bias.reshape(1, OUT),
                  ((0, 0), (0, OUT_pad - OUT))).astype(jnp.float32)

    # ---- embedding gather + im2col layout prep (plain-JAX glue, fused by jit) ----
    embeds = embed_table[data].astype(jnp.float32)                # (B, S, E)
    if B_pad != B:
        embeds = jnp.pad(embeds, ((0, B_pad - B), (0, 0), (0, 0)))

    im_blocks, w_blocks, b_blocks = [], [], []
    for K, w, b in zip(kernel_sizes, conv_ws, conv_bs):
        L = S - K + 1
        cols = jnp.concatenate([embeds[:, k:k + L, :] for k in range(K)],
                               axis=-1)                           # (B_pad, L, K*E)
        # edge-replicate extra rows: duplicates never change the max-pool
        cols = jnp.pad(cols, ((0, 0), (0, L_pad - L), (0, 0)), mode="edge")
        im_blocks.append(cols.astype(mxu_dtype))
        w2 = jnp.pad(w.reshape(K * E, KN), ((0, 0), (0, KN_pad - KN)))
        w_blocks.append(w2.astype(mxu_dtype))
        b_blocks.append(jnp.pad(b.reshape(1, KN),
                                ((0, 0), (0, KN_pad - KN))).astype(jnp.float32))

    kernel = _make_scnn_kernel(n, TB, L_pad, KN_pad, OUT_pad)

    def _full(shape):
        nd = len(shape)
        return pl.BlockSpec(shape, lambda b, _nd=nd: (0,) * _nd)

    in_specs = [pl.BlockSpec((TB, L_pad, im.shape[-1]), lambda b: (b, 0, 0))
                for im in im_blocks]
    in_specs += [_full(w.shape) for w in w_blocks]
    in_specs += [_full(bb.shape) for bb in b_blocks]
    in_specs += [_full(c.shape) for c in fcw_chunks]
    in_specs += [_full(fcb.shape)]

    out = pl.pallas_call(
        kernel,
        out_shape=jax.ShapeDtypeStruct((B_pad, OUT_pad), jnp.float32),
        grid=(B_pad // TB,),
        in_specs=in_specs,
        out_specs=pl.BlockSpec((TB, OUT_pad), lambda b: (b, 0)),
        compiler_params=pltpu.CompilerParams(dimension_semantics=("parallel",)),
    )(*im_blocks, *w_blocks, *b_blocks, *fcw_chunks, fcb)

    return out[:B, :OUT]


def scnn_reference(data, params, kernel_sizes, *, training=False, eps=None):
    """Pure-JAX f32 reference mirroring the PyTorch forward."""
    embeds = params["embed"][data].astype(jnp.float32)            # (B, S, E)
    B, S, _ = embeds.shape
    feats = []
    for K, w, b in zip(kernel_sizes, params["conv_w"], params["conv_b"]):
        L = S - K + 1
        conv = jnp.zeros((B, L, w.shape[2]), jnp.float32)
        for k in range(K):
            conv = conv + jnp.einsum("ble,ec->blc", embeds[:, k:k + L, :], w[k])
        conv = jax.nn.relu(conv + b[None])
        feats.append(jnp.max(conv, axis=1))
    x = jnp.concatenate(feats, axis=1)
    if training and eps is not None:
        fc_w = params["fc_mu"] + jax.nn.softplus(params["fc_sigma"] - 2.0) * eps
    else:
        fc_w = params["fc_mu"]
    return x @ fc_w.T + params["fc_bias"][0]


if __name__ == "__main__":
    key = jax.random.PRNGKey(0)
    B, S, E, V = 16, 16, 32, 50
    kernel_sizes = (3, 4, 5)
    KN = 200                               # kernel_num; 3 * 200 = 600 matches fc_mu (64, 600)
    OUT = 64
    F = KN * len(kernel_sizes)

    keys = jax.random.split(key, 11)
    data = jax.random.randint(keys[0], (B, S), 0, V)

    embed = 0.1 * jax.random.normal(keys[1], (V, E), jnp.float32)
    conv_w = [(1.0 / (K * E) ** 0.5) *
              jax.random.normal(keys[2 + i], (K, E, KN), jnp.float32)
              for i, K in enumerate(kernel_sizes)]
    conv_b = [0.01 * jax.random.normal(keys[5 + i], (1, KN), jnp.float32)
              for i, K in enumerate(kernel_sizes)]
    # (module inits fc_mu/fc_bias to zeros; use small non-zero test values so
    #  the eval branch check is non-trivial — forward semantics are unchanged)
    fc_mu = 0.05 * jax.random.normal(keys[8], (OUT, F), jnp.float32)
    fc_sigma = jax.random.normal(keys[9], (OUT, F), jnp.float32)
    fc_bias = 0.01 * jax.random.normal(keys[10], (1, OUT), jnp.float32)
    eps = jax.random.normal(keys[0], (OUT, F), jnp.float32)       # rsample noise

    params = dict(embed=embed, conv_w=conv_w, conv_b=conv_b,
                  fc_mu=fc_mu, fc_sigma=fc_sigma, fc_bias=fc_bias)

    # Training branch, f32 MXU operands: tight check of the full pipeline.
    out_train = jax.block_until_ready(
        scnn_forward(data, params, eps, kernel_sizes=kernel_sizes,
                     training=True, mxu_dtype=jnp.float32))
    ref_train = scnn_reference(data, params, kernel_sizes, training=True, eps=eps)
    assert out_train.shape == (B, OUT), out_train.shape
    assert jnp.allclose(out_train, ref_train, rtol=2e-3, atol=2e-3), \
        float(jnp.max(jnp.abs(out_train - ref_train)))

    # Eval branch, bf16 conv operands (default fast path): F.linear(x, fc_mu, fc_bias).
    out_eval = jax.block_until_ready(
        scnn_forward(data, params, kernel_sizes=kernel_sizes, training=False))
    ref_eval = scnn_reference(data, params, kernel_sizes, training=False)
    assert out_eval.shape == (B, OUT), out_eval.shape
    assert jnp.allclose(out_eval, ref_eval, rtol=2e-2, atol=2e-2), \
        float(jnp.max(jnp.abs(out_eval - ref_eval)))

    print("KERNEL_OK")
</pallas_src>

<mosaic_0001>
module attributes {stable_mosaic.version = 11 : i64} {
  func.func @kernel(%arg0: i32, %arg1: memref<8x16x96xf32, #tpu.memory_space<vmem>>, %arg2: memref<8x16x128xf32, #tpu.memory_space<vmem>>, %arg3: memref<8x16x160xf32, #tpu.memory_space<vmem>>, %arg4: memref<96x256xf32, #tpu.memory_space<vmem>>, %arg5: memref<128x256xf32, #tpu.memory_space<vmem>>, %arg6: memref<160x256xf32, #tpu.memory_space<vmem>>, %arg7: memref<1x256xf32, #tpu.memory_space<vmem>>, %arg8: memref<1x256xf32, #tpu.memory_space<vmem>>, %arg9: memref<1x256xf32, #tpu.memory_space<vmem>>, %arg10: memref<256x128xf32, #tpu.memory_space<vmem>>, %arg11: memref<256x128xf32, #tpu.memory_space<vmem>>, %arg12: memref<256x128xf32, #tpu.memory_space<vmem>>, %arg13: memref<1x128xf32, #tpu.memory_space<vmem>>, %arg14: memref<8x128xf32, #tpu.memory_space<vmem>>) attributes {dimension_semantics = [#tpu.dimension_semantics<parallel>], iteration_bounds = array<i64: 2>, scalar_prefetch = 0 : i64, scratch_operands = 0 : i64, tpu.core_type = #tpu.core_type<tc>, window_params = [{transform_indices = @transform_0, window_bounds = array<i64: 8, 16, 96>}, {transform_indices = @transform_1, window_bounds = array<i64: 8, 16, 128>}, {transform_indices = @transform_2, window_bounds = array<i64: 8, 16, 160>}, {pipeline_mode = #tpu.pipeline_mode<synchronous>, transform_indices = @transform_3, window_bounds = array<i64: 96, 256>}, {pipeline_mode = #tpu.pipeline_mode<synchronous>, transform_indices = @transform_4, window_bounds = array<i64: 128, 256>}, {pipeline_mode = #tpu.pipeline_mode<synchronous>, transform_indices = @transform_5, window_bounds = array<i64: 160, 256>}, {pipeline_mode = #tpu.pipeline_mode<synchronous>, transform_indices = @transform_6, window_bounds = array<i64: 1, 256>}, {pipeline_mode = #tpu.pipeline_mode<synchronous>, transform_indices = @transform_7, window_bounds = array<i64: 1, 256>}, {pipeline_mode = #tpu.pipeline_mode<synchronous>, transform_indices = @transform_8, window_bounds = array<i64: 1, 256>}, {pipeline_mode = #tpu.pipeline_mode<synchronous>, transform_indices = @transform_9, window_bounds = array<i64: 256, 128>}, {pipeline_mode = #tpu.pipeline_mode<synchronous>, transform_indices = @transform_10, window_bounds = array<i64: 256, 128>}, {pipeline_mode = #tpu.pipeline_mode<synchronous>, transform_indices = @transform_11, window_bounds = array<i64: 256, 128>}, {pipeline_mode = #tpu.pipeline_mode<synchronous>, transform_indices = @transform_12, window_bounds = array<i64: 1, 128>}, {transform_indices = @transform_13, window_bounds = array<i64: 8, 128>}]} {
    %cst = arith.constant 0.000000e+00 : f32
    %0 = vector.broadcast %cst : f32 to vector<8x128xf32>
    %c0 = arith.constant 0 : index
    %c0_0 = arith.constant 0 : index
    %c0_1 = arith.constant 0 : index
    %1 = vector.load %arg1[%c0, %c0_0, %c0_1] : memref<8x16x96xf32, #tpu.memory_space<vmem>>, vector<8x16x96xf32>
    %2 = vector.shape_cast %1 : vector<8x16x96xf32> to vector<128x96xf32>
    %c0_2 = arith.constant 0 : index
    %c0_3 = arith.constant 0 : index
    %3 = vector.load %arg4[%c0_2, %c0_3] : memref<96x256xf32, #tpu.memory_space<vmem>>, vector<96x256xf32>
    %cst_4 = arith.constant dense<0.000000e+00> : vector<128x256xf32>
    %4 = tpu.matmul %2, %3, %cst_4 {dimension_numbers = #tpu.dot_dimension_numbers<[1], [0], [0], [1], [0, 0, 1, 1], [], []>} : vector<128x96xf32>, vector<96x256xf32>, vector<128x256xf32> -> vector<128x256xf32>
    %5 = vector.shape_cast %4 : vector<128x256xf32> to vector<8x16x256xf32>
    %c0_5 = arith.constant 0 : index
    %c0_6 = arith.constant 0 : index
    %6 = vector.load %arg7[%c0_5, %c0_6] : memref<1x256xf32, #tpu.memory_space<vmem>>, vector<1x256xf32>
    %7 = vector.shape_cast %6 : vector<1x256xf32> to vector<1x1x256xf32>
    %8 = vector.broadcast %7 : vector<1x1x256xf32> to vector<8x16x256xf32>
    %9 = arith.addf %5, %8 : vector<8x16x256xf32>
    %cst_7 = arith.constant 0.000000e+00 : f32
    %10 = vector.broadcast %cst_7 : f32 to vector<8x16x256xf32>
    %11 = arith.maximumf %9, %10 : vector<8x16x256xf32>
    %cst_8 = arith.constant dense<0xFF800000> : vector<8x256xf32>
    %12 = vector.multi_reduction <maximumf>, %11, %cst_8 [1] : vector<8x16x256xf32> to vector<8x256xf32>
    %c0_9 = arith.constant 0 : index
    %c0_10 = arith.constant 0 : index
    %13 = vector.load %arg10[%c0_9, %c0_10] : memref<256x128xf32, #tpu.memory_space<vmem>>, vector<256x128xf32>
    %cst_11 = arith.constant dense<0.000000e+00> : vector<8x128xf32>
    %14 = tpu.matmul %12, %13, %cst_11 {dimension_numbers = #tpu.dot_dimension_numbers<[1], [0], [0], [1], [0, 0, 1, 1], [], []>} : vector<8x256xf32>, vector<256x128xf32>, vector<8x128xf32> -> vector<8x128xf32>
    %15 = arith.addf %0, %14 : vector<8x128xf32>
    %c0_12 = arith.constant 0 : index
    %c0_13 = arith.constant 0 : index
    %c0_14 = arith.constant 0 : index
    %16 = vector.load %arg2[%c0_12, %c0_13, %c0_14] : memref<8x16x128xf32, #tpu.memory_space<vmem>>, vector<8x16x128xf32>
    %17 = vector.shape_cast %16 : vector<8x16x128xf32> to vector<128x128xf32>
    %c0_15 = arith.constant 0 : index
    %c0_16 = arith.constant 0 : index
    %18 = vector.load %arg5[%c0_15, %c0_16] : memref<128x256xf32, #tpu.memory_space<vmem>>, vector<128x256xf32>
    %cst_17 = arith.constant dense<0.000000e+00> : vector<128x256xf32>
    %19 = tpu.matmul %17, %18, %cst_17 {dimension_numbers = #tpu.dot_dimension_numbers<[1], [0], [0], [1], [0, 0, 1, 1], [], []>} : vector<128x128xf32>, vector<128x256xf32>, vector<128x256xf32> -> vector<128x256xf32>
    %20 = vector.shape_cast %19 : vector<128x256xf32> to vector<8x16x256xf32>
    %c0_18 = arith.constant 0 : index
    %c0_19 = arith.constant 0 : index
    %21 = vector.load %arg8[%c0_18, %c0_19] : memref<1x256xf32, #tpu.memory_space<vmem>>, vector<1x256xf32>
    %22 = vector.shape_cast %21 : vector<1x256xf32> to vector<1x1x256xf32>
    %23 = vector.broadcast %22 : vector<1x1x256xf32> to vector<8x16x256xf32>
    %24 = arith.addf %20, %23 : vector<8x16x256xf32>
    %cst_20 = arith.constant 0.000000e+00 : f32
    %25 = vector.broadcast %cst_20 : f32 to vector<8x16x256xf32>
    %26 = arith.maximumf %24, %25 : vector<8x16x256xf32>
    %cst_21 = arith.constant dense<0xFF800000> : vector<8x256xf32>
    %27 = vector.multi_reduction <maximumf>, %26, %cst_21 [1] : vector<8x16x256xf32> to vector<8x256xf32>
    %c0_22 = arith.constant 0 : index
    %c0_23 = arith.constant 0 : index
    %28 = vector.load %arg11[%c0_22, %c0_23] : memref<256x128xf32, #tpu.memory_space<vmem>>, vector<256x128xf32>
    %cst_24 = arith.constant dense<0.000000e+00> : vector<8x128xf32>
    %29 = tpu.matmul %27, %28, %cst_24 {dimension_numbers = #tpu.dot_dimension_numbers<[1], [0], [0], [1], [0, 0, 1, 1], [], []>} : vector<8x256xf32>, vector<256x128xf32>, vector<8x128xf32> -> vector<8x128xf32>
    %30 = arith.addf %15, %29 : vector<8x128xf32>
    %c0_25 = arith.constant 0 : index
    %c0_26 = arith.constant 0 : index
    %c0_27 = arith.constant 0 : index
    %31 = vector.load %arg3[%c0_25, %c0_26, %c0_27] : memref<8x16x160xf32, #tpu.memory_space<vmem>>, vector<8x16x160xf32>
    %32 = vector.shape_cast %31 : vector<8x16x160xf32> to vector<128x160xf32>
    %c0_28 = arith.constant 0 : index
    %c0_29 = arith.constant 0 : index
    %33 = vector.load %arg6[%c0_28, %c0_29] : memref<160x256xf32, #tpu.memory_space<vmem>>, vector<160x256xf32>
    %cst_30 = arith.constant dense<0.000000e+00> : vector<128x256xf32>
    %34 = tpu.matmul %32, %33, %cst_30 {dimension_numbers = #tpu.dot_dimension_numbers<[1], [0], [0], [1], [0, 0, 1, 1], [], []>} : vector<128x160xf32>, vector<160x256xf32>, vector<128x256xf32> -> vector<128x256xf32>
    %35 = vector.shape_cast %34 : vector<128x256xf32> to vector<8x16x256xf32>
    %c0_31 = arith.constant 0 : index
    %c0_32 = arith.constant 0 : index
    %36 = vector.load %arg9[%c0_31, %c0_32] : memref<1x256xf32, #tpu.memory_space<vmem>>, vector<1x256xf32>
    %37 = vector.shape_cast %36 : vector<1x256xf32> to vector<1x1x256xf32>
    %38 = vector.broadcast %37 : vector<1x1x256xf32> to vector<8x16x256xf32>
    %39 = arith.addf %35, %38 : vector<8x16x256xf32>
    %cst_33 = arith.constant 0.000000e+00 : f32
    %40 = vector.broadcast %cst_33 : f32 to vector<8x16x256xf32>
    %41 = arith.maximumf %39, %40 : vector<8x16x256xf32>
    %cst_34 = arith.constant dense<0xFF800000> : vector<8x256xf32>
    %42 = vector.multi_reduction <maximumf>, %41, %cst_34 [1] : vector<8x16x256xf32> to vector<8x256xf32>
    %c0_35 = arith.constant 0 : index
    %c0_36 = arith.constant 0 : index
    %43 = vector.load %arg12[%c0_35, %c0_36] : memref<256x128xf32, #tpu.memory_space<vmem>>, vector<256x128xf32>
    %cst_37 = arith.constant dense<0.000000e+00> : vector<8x128xf32>
    %44 = tpu.matmul %42, %43, %cst_37 {dimension_numbers = #tpu.dot_dimension_numbers<[1], [0], [0], [1], [0, 0, 1, 1], [], []>} : vector<8x256xf32>, vector<256x128xf32>, vector<8x128xf32> -> vector<8x128xf32>
    %45 = arith.addf %30, %44 : vector<8x128xf32>
    %c0_38 = arith.constant 0 : index
    %c0_39 = arith.constant 0 : index
    %46 = vector.load %arg13[%c0_38, %c0_39] : memref<1x128xf32, #tpu.memory_space<vmem>>, vector<1x128xf32>
    %47 = vector.broadcast %46 : vector<1x128xf32> to vector<8x128xf32>
    %48 = arith.addf %45, %47 : vector<8x128xf32>
    %c0_40 = arith.constant 0 : index
    %c0_41 = arith.constant 0 : index
    %49 = vector.load %arg14[%c0_40, %c0_41] : memref<8x128xf32, #tpu.memory_space<vmem>>, vector<8x128xf32>
    tpu.vector_store %arg14[%c0_40, %c0_41], %48 {strides = array<i32>} : memref<8x128xf32, #tpu.memory_space<vmem>>, vector<8x128xf32>,
    return
  }
  func.func @transform_0(%arg0: i32) -> (i32, i32, i32) {
    %c0_i32 = arith.constant 0 : i32
    %c0_i32_0 = arith.constant 0 : i32
    %c0_i32_1 = arith.constant 0 : i32
    return %arg0, %c0_i32, %c0_i32_0 : i32, i32, i32
  }
  func.func @transform_1(%arg0: i32) -> (i32, i32, i32) {
    %c0_i32 = arith.constant 0 : i32
    %c0_i32_0 = arith.constant 0 : i32
    %c0_i32_1 = arith.constant 0 : i32
    return %arg0, %c0_i32, %c0_i32_0 : i32, i32, i32
  }
  func.func @transform_2(%arg0: i32) -> (i32, i32, i32) {
    %c0_i32 = arith.constant 0 : i32
    %c0_i32_0 = arith.constant 0 : i32
    %c0_i32_1 = arith.constant 0 : i32
    return %arg0, %c0_i32, %c0_i32_0 : i32, i32, i32
  }
  func.func @transform_3(%arg0: i32) -> (i32, i32) {
    %c0_i32 = arith.constant 0 : i32
    %c0_i32_0 = arith.constant 0 : i32
    %c0_i32_1 = arith.constant 0 : i32
    return %c0_i32, %c0_i32_0 : i32, i32
  }
  func.func @transform_4(%arg0: i32) -> (i32, i32) {
    %c0_i32 = arith.constant 0 : i32
    %c0_i32_0 = arith.constant 0 : i32
    %c0_i32_1 = arith.constant 0 : i32
    return %c0_i32, %c0_i32_0 : i32, i32
  }
  func.func @transform_5(%arg0: i32) -> (i32, i32) {
    %c0_i32 = arith.constant 0 : i32
    %c0_i32_0 = arith.constant 0 : i32
    %c0_i32_1 = arith.constant 0 : i32
    return %c0_i32, %c0_i32_0 : i32, i32
  }
  func.func @transform_6(%arg0: i32) -> (i32, i32) {
    %c0_i32 = arith.constant 0 : i32
    %c0_i32_0 = arith.constant 0 : i32
    %c0_i32_1 = arith.constant 0 : i32
    return %c0_i32, %c0_i32_0 : i32, i32
  }
  func.func @transform_7(%arg0: i32) -> (i32, i32) {
    %c0_i32 = arith.constant 0 : i32
    %c0_i32_0 = arith.constant 0 : i32
    %c0_i32_1 = arith.constant 0 : i32
    return %c0_i32, %c0_i32_0 : i32, i32
  }
  func.func @transform_8(%arg0: i32) -> (i32, i32) {
    %c0_i32 = arith.constant 0 : i32
    %c0_i32_0 = arith.constant 0 : i32
    %c0_i32_1 = arith.constant 0 : i32
    return %c0_i32, %c0_i32_0 : i32, i32
  }
  func.func @transform_9(%arg0: i32) -> (i32, i32) {
    %c0_i32 = arith.constant 0 : i32
    %c0_i32_0 = arith.constant 0 : i32
    %c0_i32_1 = arith.constant 0 : i32
    return %c0_i32, %c0_i32_0 : i32, i32
  }
  func.func @transform_10(%arg0: i32) -> (i32, i32) {
    %c0_i32 = arith.constant 0 : i32
    %c0_i32_0 = arith.constant 0 : i32
    %c0_i32_1 = arith.constant 0 : i32
    return %c0_i32, %c0_i32_0 : i32, i32
  }
  func.func @transform_11(%arg0: i32) -> (i32, i32) {
    %c0_i32 = arith.constant 0 : i32
    %c0_i32_0 = arith.constant 0 : i32
    %c0_i32_1 = arith.constant 0 : i32
    return %c0_i32, %c0_i32_0 : i32, i32
  }
  func.func @transform_12(%arg0: i32) -> (i32, i32) {
    %c0_i32 = arith.constant 0 : i32
    %c0_i32_0 = arith.constant 0 : i32
    %c0_i32_1 = arith.constant 0 : i32
    return %c0_i32, %c0_i32_0 : i32, i32
  }
  func.func @transform_13(%arg0: i32) -> (i32, i32) {
    %c0_i32 = arith.constant 0 : i32
    %c0_i32_0 = arith.constant 0 : i32
    return %arg0, %c0_i32 : i32, i32
  }
}

</mosaic_0001>

<bundles_post_ra>
// kernel: scnn_forward.1
= control target key start
LH: loop header
LB: loop body
LE: loop exit
PB: predicated region body
PF: predicated region fallthrough
CT: control target
= control target key end

     0   :  { %18 = vsyncpa [#allocation3], 0  ;;  %s3748_s0 = inlined_call_operand.vmem [shape: f32[16,16,96], index: 0, kind: input, shape index: {}]   ;;  %s3749_s1 = inlined_call_operand.vmem [shape: f32[16,16,128], index: 1, kind: input, shape index: {}]   ;;  %s3750_s2 = inlined_call_operand.vmem [shape: f32[16,16,160], index: 2, kind: input, shape index: {}]   ;;  %s3751_s3 = inlined_call_operand.vmem [shape: f32[96,256], index: 3, kind: input, shape index: {}]   ;;  %s3752_s4 = inlined_call_operand.vmem [shape: f32[128,256], index: 4, kind: input, shape index: {}]   ;;  %s3753_s5 = inlined_call_operand.vmem [shape: f32[160,256], index: 5, kind: input, shape index: {}]   ;;  %s3754_s6 = inlined_call_operand.vmem [shape: f32[1,256], index: 6, kind: input, shape index: {}]   ;;  %s3755_s7 = inlined_call_operand.vmem [shape: f32[1,256], index: 7, kind: input, shape index: {}]   ;;  %s3756_s8 = inlined_call_operand.vmem [shape: f32[1,256], index: 8, kind: input, shape index: {}]   ;;  %s3757_s9 = inlined_call_operand.vmem [shape: f32[256,128], index: 9, kind: input, shape index: {}]   ;;  %s3758_s10 = inlined_call_operand.vmem [shape: f32[256,128], index: 10, kind: input, shape index: {}]   ;;  %s3759_s11 = inlined_call_operand.vmem [shape: f32[256,128], index: 11, kind: input, shape index: {}]   ;;  %s3760_s12 = inlined_call_operand.vmem [shape: f32[1,128], index: 12, kind: input, shape index: {}]   ;;  %s3761_s13 = inlined_call_operand.hbm [shape: f32[16,128], index: 13, kind: output, shape index: {}]  }
   0x1   :  { %20 = vsyncpa [#allocation3 + $0x1], 0  ;;  %s2502_s25 = smov 0   ;;  %s2504_s26 = smov 0  }
   0x2   :  { %s2506_s27 = smov 0   ;;  %s2508_s28 = smov 0  }
   0x3 LB: > { %3767 = sst [smem:[#allocation5_spill]] %s2426_s27  ;;  %s3762_s29 = sadd.s32 4294967295, %s2430_s28   ;;  %s2430_s28 = sphi %s2508_s28, %s3777_s28   ;;  %s2426_s27 = sphi %s2506_s27, %s3779_s27   ;;  %s2422_s26 = sphi %s2504_s26, %s3781_s26   ;;  %s2418_s25 = sphi %s2502_s25, %s3780_s25  }
   0x4   : > { %s2243_s30 = sadd.s32 4294967294, %s2430_s28   ;;  %s2525_s14 = sadd.s32 1, %s2430_s28  }
   0x5   : > { %3768 = sst [smem:[#allocation6_spill]] %s2525_s14  ;;  %s321_s15 = sadd.s32 1, %s2426_s27 }
   0x6   : > { %s318_s16 = ssub.s32 %s2430_s28, %s2525_s14  ;;  %p331_p0 = scmp.ne.s32.totalorder %s2426_s27, %s2422_s26 }
   0x7   : > { %p319_p1 = scmp.eq.s32.totalorder %s318_s16, 0  ;;  %p332_p2 = scmp.eq.s32.totalorder %s3762_s29, 1 }
   0x8   : > { %p337_p3 = scmp.ne.s32.totalorder %s2422_s26, %s2418_s25  ;;  %p338_p4 = scmp.eq.s32.totalorder %s2243_s30, 1 }
   0x9   : > { %s2537_s17 = scalar_select %p319_p1, %s2426_s27, %s321_s15  }
   0xa   : > { %p2539_p5 = por %p332_p2, %p331_p0  ;;  %p2543_p6 = por %p338_p4, %p337_p3 }
   0xb   : > { %3769 = sst [smem:[#allocation7_spill]] %s2537_s17  ;;  %p2246_p7 = scmp.ge.s32.totalorder %s2430_s28, 1 }
   0xc   : > { %s3771_s19 = scalar_select %p2543_p6, 1, 0 }
   0xd   : > { %p416_p8 = scmp.lt.s32.totalorder %s2430_s28, 3 }
   0xe   : > { %3772 = sst [smem:[#allocation8_spill]] %s3771_s19 }
   0xf   : > { %p417_p9 = pnand %p2246_p7, %p416_p8 }
  0x10   : > { %s3773_s22 = sadd.s32 (!%p417_p9), 4294967295, %s2430_s28  }
  0x11   : > { %420 = sbr.rel (%p417_p9) target bundleno = 737 (0x2e1), region = 72  ;;  %s2599_s23 = sshll.u32 (!%p417_p9), %s3773_s22, 3 }
  0x12   : > { %p474_p10 = scmp.lt.s32.totalorder (!%p417_p9), %s2599_s23, 15  ;;  %s470_s22 = sand.u32 (!%p417_p9), 1, %s2422_s26  }
  0x16   : > { %v532_v0 = vld [vmem:[%s3751_s3 + $0xb0] sm:$0xff]  ;;  %v533_v1 = vld [vmem:[%s3751_s3 + $0xb8] sm:$0xff]  ;;  %v530_v4 = vld [vmem:[%s3751_s3 + $0xa0] sm:$0xff]  ;;  %s2647_s21 = scalar_select %p474_p10, %s2599_s23, 15  ;;  %vm534_vm0 = vcmask 785408   ;;  %vm1335_vm1 = vcmask 1041409  }
  0x17   : > { %v973_v2 = vld [vmem:[%s3752_s4 + $0xf0] sm:$0xff]  ;;  %587 = vmatpush.msra.mxu0 %v532_v0  ;;  %652 = vmatpush.msra.mxu1 %v533_v1  ;;  %v974_v3 = vld [vmem:[%s3752_s4 + $0xf8] sm:$0xff]  ;;  %v531_v5 = vld [vmem:[%s3751_s3 + $0xa8] sm:$0xff]  ;;  %vm1337_vm2 = vcmask 1042434   ;;  %vm1339_vm3 = vcmask 1043459   ;;  %vm1341_vm4 = vcmask 1044484  }
  0x18   : > { %975 = vmatpush.msra.mxu2 %v973_v2  ;;  %1040 = vmatpush.msra.mxu3 %v974_v3  ;;  %v971_v6 = vld [vmem:[%s3752_s4 + $0xe0] sm:$0xff]  ;;  %v972_v7 = vld [vmem:[%s3752_s4 + $0xe8] sm:$0xff]  ;;  %v528_v8 = vld [vmem:[%s3751_s3 + $0x90] sm:$0xff]  ;;  %s3774_s20 = sshll.u32 %s2647_s21, 4  ;;  %s3775_s30 = sshll.u32 %s2647_s21, 4  ;;  %vm1343_vm5 = vcmask 1045509  }
  0x19   : > { %588 = vmatpush.msra.mxu0 %v530_v4  ;;  %653 = vmatpush.msra.mxu1 %v531_v5  ;;  %v529_v9 = vld [vmem:[%s3751_s3 + $0x98] sm:$0xff]  ;;  %v969_v10 = vld [vmem:[%s3752_s4 + $0xd0] sm:$0xff]  ;;  %v526_v12 = vld [vmem:[%s3751_s3 + $0x80] sm:$0xff]  ;;  %s2697_s24 = scalar_lea.vmem %s3748_s0, %s3774_s20  ;;  %s2737_s17 = scalar_lea.vmem %s3749_s1, %s3775_s30  ;;  %vm1345_vm6 = vcmask 1046534   ;;  %vm1347_vm7 = vcmask 1047559   ;;  %vm1542_vm8 = vcmask 261120  }
  0x1a   : > { %v970_v11 = vld [vmem:[%s3752_s4 + $0xd8] sm:$0xff]  ;;  %976 = vmatpush.msra.mxu2 %v971_v6  ;;  %1041 = vmatpush.msra.mxu3 %v972_v7  ;;  %v527_v13 = vld [vmem:[%s3751_s3 + $0x88] sm:$0xff]  ;;  %v967_v14 = vld [vmem:[%s3752_s4 + $0xc0] sm:$0xff]  ;;  %s2327_s15 = sshll.u32 %s2647_s21, 5  ;;  %s2247_s30 = sshll.u32 %s470_s22, 3 }
  0x1b   : > { %589 = vmatpush.msra.mxu0 %v528_v8  ;;  %654 = vmatpush.msra.mxu1 %v529_v9  ;;  %v968_v15 = vld [vmem:[%s3752_s4 + $0xc8] sm:$0xff]  ;;  %v524_v16 = vld [vmem:[%s3751_s3 + $0x70] sm:$0xff]  ;;  %v525_v17 = vld [vmem:[%s3751_s3 + $0x78] sm:$0xff]  ;;  %s3458_s16 = scalar_lea.vmem %s3750_s2, %s2327_s15  ;;  %s472_s14 = scalar_lea.vmem [#allocation2], %s2247_s30 }
  0x1c   : > { %977 = vmatpush.msra.mxu2 %v969_v10  ;;  %1042 = vmatpush.msra.mxu3 %v970_v11  ;;  %v965_v18 = vld [vmem:[%s3752_s4 + $0xb0] sm:$0xff]  ;;  %v966_v19 = vld [vmem:[%s3752_s4 + $0xb8] sm:$0xff]  ;;  %v522_v20 = vld [vmem:[%s3751_s3 + $0x60] sm:$0xff]  ;;  %s2157_s19 = sshll.u32 %s472_s14, 4  ;;  %s2388_s30 = scalar_lea.hbm %s3761_s13, 16  ;;  %s2158_s19 = int_to_ptr.vmem [resolvable:$true] %s2157_s19 }
  0x1d   : > { %590 = vmatpush.msra.mxu0 %v526_v12  ;;  %655 = vmatpush.msra.mxu1 %v527_v13  ;;  %v523_v21 = vld [vmem:[%s3751_s3 + $0x68] sm:$0xff]  ;;  %v963_v22 = vld [vmem:[%s3752_s4 + $0xa0] sm:$0xff]  ;;  %v520_v24 = vld [vmem:[%s3751_s3 + $0x50] sm:$0xff] }
  0x1e   : > { %978 = vmatpush.msra.mxu2 %v967_v14  ;;  %1043 = vmatpush.msra.mxu3 %v968_v15  ;;  %v964_v23 = vld [vmem:[%s3752_s4 + $0xa8] sm:$0xff]  ;;  %v521_v25 = vld [vmem:[%s3751_s3 + $0x58] sm:$0xff]  ;;  %v961_v26 = vld [vmem:[%s3752_s4 + $0x90] sm:$0xff] }
  0x1f   : > { %591 = vmatpush.msra.mxu0 %v524_v16  ;;  %656 = vmatpush.msra.mxu1 %v525_v17  ;;  %v962_v27 = vld [vmem:[%s3752_s4 + $0x98] sm:$0xff]  ;;  %v518_v28 = vld [vmem:[%s3751_s3 + $0x40] sm:$0xff]  ;;  %v519_v29 = vld [vmem:[%s3751_s3 + $0x48] sm:$0xff] }
  0x20   : > { %979 = vmatpush.msra.mxu2 %v965_v18  ;;  %1044 = vmatpush.msra.mxu3 %v966_v19  ;;  %v959_v30 = vld [vmem:[%s3752_s4 + $0x80] sm:$0xff]  ;;  %v960_v31 = vld [vmem:[%s3752_s4 + $0x88] sm:$0xff]  ;;  %v516_v32 = vld [vmem:[%s3751_s3 + $0x30] sm:$0xff] }
  0x21   : > { %592 = vmatpush.msra.mxu0 %v522_v20  ;;  %657 = vmatpush.msra.mxu1 %v523_v21  ;;  %v517_v33 = vld [vmem:[%s3751_s3 + $0x38] sm:$0xff]  ;;  %v957_v34 = vld [vmem:[%s3752_s4 + $0x70] sm:$0xff]  ;;  %v514_v36 = vld [vmem:[%s3751_s3 + $0x20] sm:$0xff] }
  0x22   : > { %980 = vmatpush.msra.mxu2 %v963_v22  ;;  %1045 = vmatpush.msra.mxu3 %v964_v23  ;;  %v958_v35 = vld [vmem:[%s3752_s4 + $0x78] sm:$0xff]  ;;  %v515_v37 = vld [vmem:[%s3751_s3 + $0x28] sm:$0xff]  ;;  %v955_v38 = vld [vmem:[%s3752_s4 + $0x60] sm:$0xff] }
  0x23   : > { %593 = vmatpush.msra.mxu0 %v520_v24  ;;  %658 = vmatpush.msra.mxu1 %v521_v25  ;;  %v956_v39 = vld [vmem:[%s3752_s4 + $0x68] sm:$0xff]  ;;  %v512_v40 = vld [vmem:[%s3751_s3 + $0x10] sm:$0xff]  ;;  %v513_v41 = vld [vmem:[%s3751_s3 + $0x18] sm:$0xff] }
  0x24   : > { %981 = vmatpush.msra.mxu2 %v961_v26  ;;  %1046 = vmatpush.msra.mxu3 %v962_v27  ;;  %v953_v42 = vld [vmem:[%s3752_s4 + $0x50] sm:$0xff]  ;;  %v954_v43 = vld [vmem:[%s3752_s4 + $0x58] sm:$0xff]  ;;  %v510_v44 = vld [vmem:[%s3751_s3] sm:$0xff] }
  0x25   : > { %594 = vmatpush.msra.mxu0 %v518_v28  ;;  %659 = vmatpush.msra.mxu1 %v519_v29  ;;  %v511_v45 = vld [vmem:[%s3751_s3 + $0x8] sm:$0xff]  ;;  %v951_v46 = vld [vmem:[%s3752_s4 + $0x40] sm:$0xff]  ;;  %v949_v49 = vld [vmem:[%s3752_s4 + $0x30] sm:$0xff] }
  0x26   : > { %982 = vmatpush.msra.mxu2 %v959_v30  ;;  %1047 = vmatpush.msra.mxu3 %v960_v31  ;;  %v952_v47 = vld [vmem:[%s3752_s4 + $0x48] sm:$0xff]  ;;  %v494_v48 = vld [vmem:[%s2697_s24] sm:$0xff]  ;;  %v950_v50 = vld [vmem:[%s3752_s4 + $0x38] sm:$0xff] }
  0x27   : > { %595 = vmatpush.msra.mxu0 %v516_v32  ;;  %660 = vmatpush.msra.mxu1 %v517_v33  ;;  %v947_v51 = vld [vmem:[%s3752_s4 + $0x20] sm:$0xff]  ;;  %v948_v52 = vld [vmem:[%s3752_s4 + $0x28] sm:$0xff]  ;;  %v945_v53 = vld [vmem:[%s3752_s4 + $0x10] sm:$0xff] }
  0x28   : > { %983 = vmatpush.msra.mxu2 %v957_v34  ;;  %1048 = vmatpush.msra.mxu3 %v958_v35  ;;  %v946_v54 = vld [vmem:[%s3752_s4 + $0x18] sm:$0xff]  ;;  %v943_v55 = vld [vmem:[%s3752_s4] sm:$0xff]  ;;  %v944_v56 = vld [vmem:[%s3752_s4 + $0x8] sm:$0xff] }
  0x29   : > { %596 = vmatpush.msra.mxu0 %v514_v36  ;;  %661 = vmatpush.msra.mxu1 %v515_v37  ;;  %v495_v57 = vld [vmem:[%s2697_s24 + $0x8] sm:$0xff]  ;;  %v927_v58 = vld [vmem:[%s2737_s17] sm:$0xff]  ;;  %v496_v59 = vld [vmem:[%s2697_s24 + $0x10] sm:$0xff] }
  0x2a   : > { %984 = vmatpush.msra.mxu2 %v955_v38  ;;  %1049 = vmatpush.msra.mxu3 %v956_v39  ;;  %v928_v60 = vld [vmem:[%s2737_s17 + $0x8] sm:$0xff]  ;;  %v497_v61 = vld [vmem:[%s2697_s24 + $0x18] sm:$0xff]  ;;  %v929_v62 = vld [vmem:[%s2737_s17 + $0x10] sm:$0xff] }
  0x2b   : > { %597 = vmatpush.msra.mxu0 %v512_v40  ;;  %662 = vmatpush.msra.mxu1 %v513_v41  ;;  %v498_v63 = vld [vmem:[%s2697_s24 + $0x20] sm:$0xff]  ;;  %v930_v0 = vld [vmem:[%s2737_s17 + $0x18] sm:$0xff]  ;;  %v499_v1 = vld [vmem:[%s2697_s24 + $0x28] sm:$0xff] }
  0x2c   : > { %985 = vmatpush.msra.mxu2 %v953_v42  ;;  %1050 = vmatpush.msra.mxu3 %v954_v43  ;;  %v931_v2 = vld [vmem:[%s2737_s17 + $0x20] sm:$0xff]  ;;  %v500_v3 = vld [vmem:[%s2697_s24 + $0x30] sm:$0xff]  ;;  %v932_v4 = vld [vmem:[%s2737_s17 + $0x28] sm:$0xff] }
  0x2d   : > { %598 = vmatpush.msra.mxu0 %v510_v44  ;;  %663 = vmatpush.msra.mxu1 %v511_v45  ;;  %v501_v5 = vld [vmem:[%s2697_s24 + $0x38] sm:$0xff]  ;;  %v933_v6 = vld [vmem:[%s2737_s17 + $0x30] sm:$0xff]  ;;  %v502_v7 = vld [vmem:[%s2697_s24 + $0x40] sm:$0xff] }
  0x2e   : > { %986 = vmatpush.msra.mxu2 %v951_v46  ;;  %1051 = vmatpush.msra.mxu3 %v952_v47  ;;  %v934_v8 = vld [vmem:[%s2737_s17 + $0x38] sm:$0xff]  ;;  %v503_v9 = vld [vmem:[%s2697_s24 + $0x48] sm:$0xff]  ;;  %v935_v10 = vld [vmem:[%s2737_s17 + $0x40] sm:$0xff] }
  0x2f   : > { %2257 = vmatmul.msk.f32.vlgmr.msra.gmra.mxu0 %vm534_vm0, %v494_v48  ;;  %2273 = vmatmul.msk.f32.vlgmr.msra.gmra.mxu1 %vm534_vm0, %v494_v48  ;;  %v504_v11 = vld [vmem:[%s2697_s24 + $0x50] sm:$0xff]  ;;  %v936_v12 = vld [vmem:[%s2737_s17 + $0x48] sm:$0xff]  ;;  %v505_v13 = vld [vmem:[%s2697_s24 + $0x58] sm:$0xff] }
  0x30   : > { %987 = vmatpush.msra.mxu2 %v949_v49  ;;  %1052 = vmatpush.msra.mxu3 %v950_v50  ;;  %v937_v14 = vld [vmem:[%s2737_s17 + $0x50] sm:$0xff]  ;;  %v506_v15 = vld [vmem:[%s2697_s24 + $0x60] sm:$0xff]  ;;  %v938_v16 = vld [vmem:[%s2737_s17 + $0x58] sm:$0xff] }
  0x31   : > { %v507_v17 = vld [vmem:[%s2697_s24 + $0x68] sm:$0xff]  ;;  %v939_v18 = vld [vmem:[%s2737_s17 + $0x60] sm:$0xff]  ;;  %v508_v19 = vld [vmem:[%s2697_s24 + $0x70] sm:$0xff] }
  0x32   : > { %988 = vmatpush.msra.mxu2 %v947_v51  ;;  %1053 = vmatpush.msra.mxu3 %v948_v52  ;;  %v940_v20 = vld [vmem:[%s2737_s17 + $0x68] sm:$0xff]  ;;  %v509_v21 = vld [vmem:[%s2697_s24 + $0x78] sm:$0xff]  ;;  %v941_v22 = vld [vmem:[%s2737_s17 + $0x70] sm:$0xff]  ;;  %s2155_s24 = scalar_lea.hbm %s3761_s13, %s2599_s23 }
  0x33   : > { %v910_v23 = vld [vmem:[%s3757_s9 + $0x78] sm:$0xff]  ;;  %v909_v30 = vld [vmem:[%s3757_s9 + $0x70] sm:$0xff]  ;;  %v908_v34 = vld [vmem:[%s3757_s9 + $0x68] sm:$0xff]  ;;  %s2159_s27 = sshll.u32 %s2155_s24, 4  ;;  %s2160_s27 = int_to_ptr.hbm [resolvable:$true] %s2159_s27 }
  0x34   : > { %989 = vmatpush.msra.mxu2 %v945_v53  ;;  %1054 = vmatpush.msra.mxu3 %v946_v54  ;;  %v926_v24 = vld [vmem:[%s3757_s9 + $0xf8] sm:$0xff]  ;;  %v925_v31 = vld [vmem:[%s3757_s9 + $0xf0] sm:$0xff]  ;;  %v924_v35 = vld [vmem:[%s3757_s9 + $0xe8] sm:$0xff]  ;;  %s2382_s20 = sshra.s32 %s2160_s27, 4  ;;  %s2383_s20 = int_to_ptr.hbm [resolvable:$true] %s2382_s20 }
  0x35   : > { %v942_v27 = vld [vmem:[%s2737_s17 + $0x78] sm:$0xff]  ;;  %v1301_v36 = vld [vmem:[%s3758_s10 + $0x70] sm:$0xff]  ;;  %v907_v46 = vld [vmem:[%s3757_s9 + $0x60] sm:$0xff]  ;;  %s2145_s17 = scalar_lea.sflag [#allocation3], %s470_s22  ;;  %s2384_s23 = scalar_lea.hbm %s2383_s20, 8 }
  0x36   : > { %990 = vmatpush.msra.mxu2 %v943_v55  ;;  %1055 = vmatpush.msra.mxu3 %v944_v56  ;;  %v1302_v32 = vld [vmem:[%s3758_s10 + $0x78] sm:$0xff]  ;;  %v1317_v37 = vld [vmem:[%s3758_s10 + $0xf0] sm:$0xff]  ;;  %v923_v47 = vld [vmem:[%s3757_s9 + $0xe0] sm:$0xff]  ;;  %p2385_p11 = scmp.ne.s32.totalorder %s2383_s20, %s2384_s23  ;;  %p2389_p0 = scmp.lt.s32.totalorder %s2383_s20, %s3761_s13 }
  0x37   : > { %2258 = vmatmul.msk.f32.gmra.mxu0 %vm534_vm0, %v495_v57  ;;  %2274 = vmatmul.msk.f32.gmra.mxu1 %vm534_vm0, %v495_v57  ;;  %v1318_v33 = vld [vmem:[%s3758_s10 + $0xf8] sm:$0xff]  ;;  %v1300_v48 = vld [vmem:[%s3758_s10 + $0x68] sm:$0xff]  ;;  %v1299_v52 = vld [vmem:[%s3758_s10 + $0x60] sm:$0xff]  ;;  %p2390_p1 = scmp.lt.s32.totalorder %s2388_s30, %s2384_s23 }
  0x38   : > { %991 = vmatmul.f32.vlgmr.msra.gmra.mxu2 %v927_v58  ;;  %1056 = vmatmul.f32.vlgmr.msra.gmra.mxu3 %v927_v58  ;;  %v1316_v49 = vld [vmem:[%s3758_s10 + $0xe8] sm:$0xff]  ;;  %v906_v50 = vld [vmem:[%s3757_s9 + $0x58] sm:$0xff]  ;;  %v1315_v53 = vld [vmem:[%s3758_s10 + $0xe0] sm:$0xff]  ;;  %p2386_p12 = pnand %p2385_p11, %p2539_p5 }
  0x39   : > { %1430 = vmatpush.msrb.mxu2 %v910_v23  ;;  %1450 = vmatpush.msrb.mxu3 %v926_v24  ;;  %v922_v51 = vld [vmem:[%s3757_s9 + $0xd8] sm:$0xff]  ;;  %p2391_p2 = por %p2390_p1, %p2389_p0 }
  0x3a   : > { %1358 = vmatpush.msrb.mxu0 %v1302_v32  ;;  %1378 = vmatpush.msrb.mxu1 %v1318_v33  ;;  %p2387_p13 = pneg %p2386_p12 }
  0x3b   : > { %1431 = vmatpush.msrb.mxu2 %v909_v30  ;;  %1451 = vmatpush.msrb.mxu3 %v925_v31 }
  0x3c   : > { %1359 = vmatpush.msrb.mxu0 %v1301_v36  ;;  %1379 = vmatpush.msrb.mxu1 %v1317_v37  ;;  %p2392_p3 = pnand %p2391_p2, %p2387_p13 }
  0x3d   : > { %1432 = vmatpush.msrb.mxu2 %v908_v34  ;;  %1452 = vmatpush.msrb.mxu3 %v924_v35 }
  0x3e   : > { %1360 = vmatpush.msrb.mxu0 %v1300_v48  ;;  %1380 = vmatpush.msrb.mxu1 %v1316_v49 }
  0x3f   : > { %2259 = vmatmul.msk.f32.gmra.mxu0 %vm534_vm0, %v496_v59  ;;  %2275 = vmatmul.msk.f32.gmra.mxu1 %vm534_vm0, %v496_v59 }
  0x40   : > { %994 = vmatmul.f32.gmra.mxu2 %v928_v60  ;;  %1059 = vmatmul.f32.gmra.mxu3 %v928_v60  ;;  %v713_v60 = vld [vmem:[%s3754_s6] sm:$0x3] }
  0x41   : > { %1433 = vmatpush.msrb.mxu2 %v907_v46  ;;  %1453 = vmatpush.msrb.mxu3 %v923_v47  ;;  %v919_v47 = vld [vmem:[%s3757_s9 + $0xc0] sm:$0xff] }
  0x42   : > { %1361 = vmatpush.msrb.mxu0 %v1299_v52  ;;  %1381 = vmatpush.msrb.mxu1 %v1315_v53  ;;  %v1312_v52 = vld [vmem:[%s3758_s10 + $0xc8] sm:$0xff]  ;;  %v902_v53 = vld [vmem:[%s3757_s9 + $0x38] sm:$0xff] }
  0x43   : > { %1434 = vmatpush.msrb.mxu2 %v906_v50  ;;  %1454 = vmatpush.msrb.mxu3 %v922_v51  ;;  %v1296_v51 = vld [vmem:[%s3758_s10 + $0x48] sm:$0xff] }
  0x47   : > { %2260 = vmatmul.msk.f32.gmra.mxu0 %vm534_vm0, %v497_v61  ;;  %2276 = vmatmul.msk.f32.gmra.mxu1 %vm534_vm0, %v497_v61 }
  0x48   : > { %997 = vmatmul.f32.gmra.mxu2 %v929_v62  ;;  %1062 = vmatmul.f32.gmra.mxu3 %v929_v62 }
  0x4f   : > { %2261 = vmatmul.msk.f32.gmra.mxu0 %vm534_vm0, %v498_v63  ;;  %2277 = vmatmul.msk.f32.gmra.mxu1 %vm534_vm0, %v498_v63  ;;  %v905_v63 = vld [vmem:[%s3757_s9 + $0x50] sm:$0xff] }
  0x50   : > { %1000 = vmatmul.f32.gmra.mxu2 %v930_v0  ;;  %1065 = vmatmul.f32.gmra.mxu3 %v930_v0  ;;  %v921_v0 = vld [vmem:[%s3757_s9 + $0xd0] sm:$0xff] }
  0x51   : > { %1435 = vmatpush.msrb.mxu2 %v905_v63  ;;  %1455 = vmatpush.msrb.mxu3 %v921_v0  ;;  %v918_v63 = vld [vmem:[%s3757_s9 + $0xb8] sm:$0xff]  ;;  %v1295_v0 = vld [vmem:[%s3758_s10 + $0x40] sm:$0xff] }
  0x57   : > { %2262 = vmatmul.msk.f32.gmra.mxu0 %vm534_vm0, %v499_v1  ;;  %2278 = vmatmul.msk.f32.gmra.mxu1 %vm534_vm0, %v499_v1  ;;  %v1298_v1 = vld [vmem:[%s3758_s10 + $0x58] sm:$0xff] }
  0x58   : > { %1003 = vmatmul.f32.gmra.mxu2 %v931_v2  ;;  %1068 = vmatmul.f32.gmra.mxu3 %v931_v2  ;;  %v1314_v2 = vld [vmem:[%s3758_s10 + $0xd8] sm:$0xff] }
  0x59   : > { %1362 = vmatpush.msrb.mxu0 %v1298_v1  ;;  %1382 = vmatpush.msrb.mxu1 %v1314_v2  ;;  %v1311_v1 = vld [vmem:[%s3758_s10 + $0xc0] sm:$0xff] }
  0x5f   : > { %2263 = vmatmul.msk.f32.gmra.mxu0 %vm534_vm0, %v500_v3  ;;  %2279 = vmatmul.msk.f32.gmra.mxu1 %vm534_vm0, %v500_v3  ;;  %v904_v3 = vld [vmem:[%s3757_s9 + $0x48] sm:$0xff] }
  0x60   : > { %1006 = vmatmul.f32.gmra.mxu2 %v932_v4  ;;  %1071 = vmatmul.f32.gmra.mxu3 %v932_v4  ;;  %v920_v4 = vld [vmem:[%s3757_s9 + $0xc8] sm:$0xff] }
  0x61   : > { %1436 = vmatpush.msrb.mxu2 %v904_v3  ;;  %1456 = vmatpush.msrb.mxu3 %v920_v4 }
  0x63   : > { %1457 = vmatpush.msrb.mxu3 %v919_v47 }
  0x65   : > { %1458 = vmatpush.msrb.mxu3 %v918_v63  ;;  %v1294_v63 = vld [vmem:[%s3758_s10 + $0x38] sm:$0xff] }
  0x67   : > { %2264 = vmatmul.msk.f32.gmra.mxu0 %vm534_vm0, %v501_v5  ;;  %2280 = vmatmul.msk.f32.gmra.mxu1 %vm534_vm0, %v501_v5  ;;  %v1297_v5 = vld [vmem:[%s3758_s10 + $0x50] sm:$0xff] }
  0x68   : > { %1009 = vmatmul.f32.gmra.mxu2 %v933_v6  ;;  %1074 = vmatmul.f32.gmra.mxu3 %v933_v6  ;;  %v1313_v6 = vld [vmem:[%s3758_s10 + $0xd0] sm:$0xff] }
  0x69   : > { %1363 = vmatpush.msrb.mxu0 %v1297_v5  ;;  %1383 = vmatpush.msrb.mxu1 %v1313_v6 }
  0x6b   : > { %1364 = vmatpush.msrb.mxu0 %v1296_v51  ;;  %1384 = vmatpush.msrb.mxu1 %v1312_v52  ;;  %v917_v52 = vld [vmem:[%s3757_s9 + $0xb0] sm:$0xff] }
  0x6c   : > { %1459 = vmatpush.msrb.mxu3 %v917_v52 }
  0x6d   : > { %1365 = vmatpush.msrb.mxu0 %v1295_v0  ;;  %1385 = vmatpush.msrb.mxu1 %v1311_v1  ;;  %v1310_v0 = vld [vmem:[%s3758_s10 + $0xb8] sm:$0xff]  ;;  %v900_v1 = vld [vmem:[%s3757_s9 + $0x28] sm:$0xff] }
  0x6f   : > { %2265 = vmatmul.msk.f32.gmra.mxu0 %vm534_vm0, %v502_v7  ;;  %2281 = vmatmul.msk.f32.gmra.mxu1 %vm534_vm0, %v502_v7  ;;  %v2917_v7 = vperm.slane %v713_v60, 0 }
  0x70   : > { %1012 = vmatmul.f32.gmra.mxu2 %v934_v8  ;;  %1077 = vmatmul.f32.gmra.mxu3 %v934_v8 }
  0x71   : > { %1366 = vmatpush.msrb.mxu0 %v1294_v63  ;;  %1386 = vmatpush.msrb.mxu1 %v1310_v0  ;;  %v896_v63 = vld [vmem:[%s3757_s9 + $0x8] sm:$0xff] }
  0x77   : > { %2266 = vmatmul.msk.f32.gmra.mxu0 %vm534_vm0, %v503_v9  ;;  %2282 = vmatmul.msk.f32.gmra.mxu1 %vm534_vm0, %v503_v9  ;;  %v1105_v9 = vld [vmem:[%s3755_s7] sm:$0x3] }
  0x78   : > { %1015 = vmatmul.f32.gmra.mxu2 %v935_v10  ;;  %1080 = vmatmul.f32.gmra.mxu3 %v935_v10  ;;  %v2924_v10 = vperm.slane %v713_v60, 1 }
  0x7f   : > { %2267 = vmatmul.msk.f32.gmra.mxu0 %vm534_vm0, %v504_v11  ;;  %2283 = vmatmul.msk.f32.gmra.mxu1 %vm534_vm0, %v504_v11 }
  0x80   : > { %1018 = vmatmul.f32.gmra.mxu2 %v936_v12  ;;  %1083 = vmatmul.f32.gmra.mxu3 %v936_v12 }
  0x87   : > { %2268 = vmatmul.msk.f32.gmra.mxu0 %vm534_vm0, %v505_v13  ;;  %2284 = vmatmul.msk.f32.gmra.mxu1 %vm534_vm0, %v505_v13 }
  0x88   : > { %1021 = vmatmul.f32.gmra.mxu2 %v937_v14  ;;  %1086 = vmatmul.f32.gmra.mxu3 %v937_v14  ;;  %v2932_v14 = vperm.slane %v1105_v9, 0 }
  0x8f   : > { %2269 = vmatmul.msk.f32.gmra.mxu0 %vm534_vm0, %v506_v15  ;;  %2285 = vmatmul.msk.f32.gmra.mxu1 %vm534_vm0, %v506_v15 }
  0x90   : > { %1024 = vmatmul.f32.gmra.mxu2 %v938_v16  ;;  %1089 = vmatmul.f32.gmra.mxu3 %v938_v16 }
  0x97   : > { %2270 = vmatmul.msk.f32.gmra.mxu0 %vm534_vm0, %v507_v17  ;;  %2286 = vmatmul.msk.f32.gmra.mxu1 %vm534_vm0, %v507_v17 }
  0x98   : > { %1027 = vmatmul.f32.gmra.mxu2 %v939_v18  ;;  %1092 = vmatmul.f32.gmra.mxu3 %v939_v18 }
  0x9f   : > { %2271 = vmatmul.msk.f32.gmra.mxu0 %vm534_vm0, %v508_v19  ;;  %2287 = vmatmul.msk.f32.gmra.mxu1 %vm534_vm0, %v508_v19 }
  0xa0   : > { %1030 = vmatmul.f32.gmra.mxu2 %v940_v20  ;;  %1095 = vmatmul.f32.gmra.mxu3 %v940_v20 }
  0xa7   : > { %2272 = vmatmul.msk.f32.gmra.mxu0 %vm534_vm0, %v509_v21  ;;  %2288 = vmatmul.msk.f32.gmra.mxu1 %vm534_vm0, %v509_v21  ;;  %v2942_v21 = vperm.slane %v1105_v9, 1 }
  0xa8   : > { %1033 = vmatmul.f32.gmra.mxu2 %v941_v22  ;;  %1098 = vmatmul.f32.gmra.mxu3 %v941_v22 }
  0xac   : > { %v2811_v25 = vpop.f32.mrf.mxu0  ;;  %v2813_v26 = vpop.f32.mrf.mxu1 }
  0xad   : > { %v719_v11 = vadd.f32 %v2917_v7, %v2811_v25 }
  0xaf   : > { %v751_v25 = vmax.f32 %v719_v11, 0.0 }
  0xb0   : > { %1036 = vmatmul.f32.gmra.mxu2 %v942_v27  ;;  %1101 = vmatmul.f32.gmra.mxu3 %v942_v27  ;;  %v720_v27 = vadd.f32 %v2924_v10, %v2813_v26 }
  0xb4   : > { %v2816_v28 = vpop.f32.mrf.mxu0  ;;  %v2818_v29 = vpop.f32.mrf.mxu1 }
  0xb5   : > { %v721_v8 = vadd.f32 %v2917_v7, %v2816_v28  ;;  %v722_v20 = vadd.f32 %v2924_v10, %v2818_v29 }
  0xb7   : > { %v753_v19 = vmax.f32 %v721_v8, 0.0  ;;  %v754_v33 = vmax.f32 %v722_v20, 0.0 }
  0xb9   : > { %v783_v32 = vmax.f32 %v751_v25, %v753_v19 }
  0xbb   : > { %v2844_v38 = vpop.f32.mrf.mxu2  ;;  %v2846_v39 = vpop.f32.mrf.mxu3  ;;  %v784_v48 = vrot.slane %v783_v32, 4 }
  0xbc   : > { %v606_v40 = vpop.f32.mrf.mxu0  ;;  %v671_v41 = vpop.f32.mrf.mxu1  ;;  %v1111_v30 = vadd.f32 %v2932_v14, %v2844_v38  ;;  %v1112_v34 = vadd.f32 %v2942_v21, %v2846_v39  ;;  %v903_v39 = vld [vmem:[%s3757_s9 + $0x40] sm:$0xff] }
  0xbd   : > { %v723_v22 = vadd.f32 %v2917_v7, %v606_v40  ;;  %v724_v23 = vadd.f32 %v2924_v10, %v671_v41  ;;  %v752_v40 = vmax.f32 %v720_v27, 0.0  ;;  %1437 = vmatpush.msrb.mxu2 %v903_v39  ;;  %v785_v5 = vmax.f32 %v783_v32, %v784_v48 }
  0xbe   : > { %v1144_v50 = vmax.f32 %v1112_v34, 0.0 }
  0xbf   : > { %v755_v35 = vmax.f32 %v723_v22, 0.0  ;;  %v756_v36 = vmax.f32 %v724_v23, 0.0  ;;  %v790_v49 = vmax.f32 %v752_v40, %v754_v33  ;;  %1438 = vmatpush.msrb.mxu2 %v902_v53 }
  0xc1   : > { %v791_v6 = vrot.slane %v790_v49, 4 }
  0xc3   : > { %v995_v42 = vpop.f32.mrf.mxu2  ;;  %v2848_v43 = vpop.f32.mrf.mxu3  ;;  %v792_v25 = vmax.f32 %v790_v49, %v791_v6  ;;  %v916_v6 = vld [vmem:[%s3757_s9 + $0xa8] sm:$0xff] }
  0xc4   : > { %v609_v44 = vpop.f32.mrf.mxu0  ;;  %v674_v45 = vpop.f32.mrf.mxu1  ;;  %v1113_v24 = vadd.f32 %v2932_v14, %v995_v42  ;;  %v1114_v28 = vadd.f32 %v2942_v21, %v2848_v43  ;;  %v1143_v43 = vmax.f32 %v1111_v30, 0.0  ;;  %1460 = vmatpush.msrb.mxu3 %v916_v6 }
  0xc5   : > { %v725_v15 = vadd.f32 %v2917_v7, %v609_v44  ;;  %v726_v16 = vadd.f32 %v2924_v10, %v674_v45 }
  0xc6   : > { %v1145_v37 = vmax.f32 %v1113_v24, 0.0  ;;  %v1146_v41 = vmax.f32 %v1114_v28, 0.0  ;;  %v786_v24 = vrot.slane %v785_v5, 2 }
  0xc7   : > { %v757_v31 = vmax.f32 %v725_v15, 0.0  ;;  %v758_v29 = vmax.f32 %v726_v16, 0.0 }
  0xc8   : > { %v1175_v60 = vmax.f32 %v1143_v43, %v1145_v37  ;;  %v1182_v2 = vmax.f32 %v1144_v50, %v1146_v41  ;;  %v793_v37 = vrot.slane %v792_v25, 2 }
  0xc9   : > { %v797_v44 = vmax.f32 %v755_v35, %v757_v31  ;;  %v804_v45 = vmax.f32 %v756_v36, %v758_v29  ;;  %v787_v36 = vmax.f32 %v785_v5, %v786_v24 }
  0xca   : > { %v1176_v8 = vrot.slane %v1175_v60, 4  ;;  %v1183_v9 = vrot.slane %v1182_v2, 4  ;;  %v794_v53 = vmax.f32 %v792_v25, %v793_v37 }
  0xcb   : > { %v2874_v54 = vpop.f32.mrf.mxu2  ;;  %v2876_v55 = vpop.f32.mrf.mxu3  ;;  %v798_v3 = vrot.slane %v797_v44, 4  ;;  %v805_v4 = vrot.slane %v804_v45, 4 }
  0xcc   : > { %v2878_v56 = vpop.f32.mrf.mxu0  ;;  %v2880_v57 = vpop.f32.mrf.mxu1  ;;  %v1177_v28 = vmax.f32 %v1175_v60, %v1176_v8  ;;  %v1184_v29 = vmax.f32 %v1182_v2, %v1183_v9  ;;  %v788_v2 = vrot.slane %v787_v36, 1  ;;  %v1293_v8 = vld [vmem:[%s3758_s10 + $0x30] sm:$0xff] }
  0xcd   : > { %v799_v16 = vmax.f32 %v797_v44, %v798_v3  ;;  %v806_v19 = vmax.f32 %v804_v45, %v805_v4  ;;  %v727_v30 = vadd.f32 %v2917_v7, %v2878_v56  ;;  %v728_v32 = vadd.f32 %v2924_v10, %v2880_v57  ;;  %v1309_v9 = vld [vmem:[%s3758_s10 + $0xb0] sm:$0xff]  ;;  %1367 = vmatpush.msrb.mxu0 %v1293_v8 }
  0xce   : > { %v1178_v56 = vrot.slane %v1177_v28, 2  ;;  %v1185_v44 = vrot.slane %v1184_v29, 2  ;;  %1387 = vmatpush.msrb.mxu1 %v1309_v9  ;;  %v1533_v9 = vld [vmem:[%s3753_s5 + $0xf8] sm:$0xff] }
  0xcf   : > { %v800_v33 = vrot.slane %v799_v16, 2  ;;  %v807_v34 = vrot.slane %v806_v19, 2  ;;  %v759_v41 = vmax.f32 %v727_v30, 0.0  ;;  %v760_v45 = vmax.f32 %v728_v32, 0.0  ;;  %v899_v30 = vld [vmem:[%s3757_s9 + $0x20] sm:$0xff] }
  0xd0   : > { %v1179_v3 = vmax.f32 %v1177_v28, %v1178_v56 }
  0xd1   : > { %v801_v47 = vmax.f32 %v799_v16, %v800_v33  ;;  %v808_v48 = vmax.f32 %v806_v19, %v807_v34  ;;  %v1186_v16 = vmax.f32 %v1184_v29, %v1185_v44  ;;  %v898_v33 = vld [vmem:[%s3757_s9 + $0x18] sm:$0xff]  ;;  %v897_v44 = vld [vmem:[%s3757_s9 + $0x10] sm:$0xff] }
  0xd2   : > { %v1180_v34 = vrot.slane %v1179_v3, 1 }
  0xd3   : > { %v2882_v58 = vpop.f32.mrf.mxu2  ;;  %v2884_v59 = vpop.f32.mrf.mxu3  ;;  %v802_v24 = vrot.slane %v801_v47, 1  ;;  %v809_v25 = vrot.slane %v808_v48, 1 }
  0xd4   : > { %v2889_v61 = vpop.f32.mrf.mxu0  ;;  %v2891_v62 = vpop.f32.mrf.mxu1  ;;  %v1117_v31 = vadd.f32 %v2932_v14, %v2882_v58  ;;  %v1118_v35 = vadd.f32 %v2942_v21, %v2884_v59  ;;  %v1116_v58 = vadd.f32 %v2942_v21, %v2876_v55  ;;  %v901_v55 = vld [vmem:[%s3757_s9 + $0x30] sm:$0xff] }
  0xd5   : > { %v729_v20 = vadd.f32 %v2917_v7, %v2889_v61  ;;  %v730_v27 = vadd.f32 %v2924_v10, %v2891_v62  ;;  %v1115_v61 = vadd.f32 %v2932_v14, %v2874_v54  ;;  %1439 = vmatpush.msrb.mxu2 %v901_v55  ;;  %v810_v56 = vmax.f32 %v808_v48, %v809_v25 }
  0xd6   : > { %v1149_v43 = vmax.f32 %v1117_v31, 0.0  ;;  %v1150_v59 = vmax.f32 %v1118_v35, 0.0  ;;  %v1148_v4 = vmax.f32 %v1116_v58, 0.0  ;;  %v1187_v35 = vrot.slane %v1186_v16, 1 }
  0xd7   : > { %v761_v62 = vmax.f32 %v729_v20, 0.0  ;;  %v762_v40 = vmax.f32 %v730_v27, 0.0  ;;  %v1147_v54 = vmax.f32 %v1115_v61, 0.0  ;;  %1440 = vmatpush.msrb.mxu2 %v900_v1  ;;  %v795_v61 = vrot.slane %v794_v53, 1 }
  0xd8   : > { %v1196_v27 = vmax.f32 %v1148_v4, %v1150_v59  ;;  %v3081_v0 = vmax.f32 %v1186_v16, %v1187_v35 }
  0xd9   : > { %v811_v49 = vmax.f32 %v759_v41, %v761_v62  ;;  %v818_v60 = vmax.f32 %v760_v45, %v762_v40  ;;  %v1189_v5 = vmax.f32 %v1147_v54, %v1149_v43  ;;  %1441 = vmatpush.msrb.mxu2 %v899_v30  ;;  %v796_v52 = vmax.f32 %v794_v53, %v795_v61 }
  0xda   : > { %v1197_v58 = vrot.slane %v1196_v27, 4 }
  0xdb   : > { %v2928_v12 = vpop.f32.mrf.mxu2  ;;  %v2930_v13 = vpop.f32.mrf.mxu3  ;;  %v812_v28 = vrot.slane %v811_v49, 4  ;;  %v819_v31 = vrot.slane %v818_v60, 4  ;;  %v1190_v32 = vrot.slane %v1189_v5, 4  ;;  %1442 = vmatpush.msrb.mxu2 %v898_v33  ;;  %v3094_v4 = vsel %vm1335_vm1, %v810_v56, %v796_v52  ;;  %v1308_v33 = vld [vmem:[%s3758_s10 + $0xa8] sm:$0xff]  ;;  %v1307_v56 = vld [vmem:[%s3758_s10 + $0xa0] sm:$0xff] }
  0xdc   : > { %v2936_v17 = vpop.f32.mrf.mxu0  ;;  %v2938_v18 = vpop.f32.mrf.mxu1  ;;  %v1119_v48 = vadd.f32 %v2932_v14, %v2928_v12  ;;  %v1120_v12 = vadd.f32 %v2942_v21, %v2930_v13  ;;  %1388 = vmatpush.msrb.mxu1 %v1308_v33  ;;  %v1527_v52 = vld [vmem:[%s3753_s5 + $0xc8] sm:$0xff] }
  0xdd   : > { %v731_v29 = vadd.f32 %v2917_v7, %v2936_v17  ;;  %v820_v54 = vmax.f32 %v818_v60, %v819_v31  ;;  %1443 = vmatpush.msrb.mxu2 %v897_v44  ;;  %v3079_v60 = vmax.f32 %v1179_v3, %v1180_v34  ;;  %v895_v3 = vld [vmem:[%s3757_s9] sm:$0xff]  ;;  %v1531_v31 = vld [vmem:[%s3753_s5 + $0xe8] sm:$0xff]  ;;  %v1529_v44 = vld [vmem:[%s3753_s5 + $0xd8] sm:$0xff] }
  0xde   : > { %v1151_v16 = vmax.f32 %v1119_v48, 0.0  ;;  %1389 = vmatpush.msrb.mxu1 %v1307_v56 }
  0xdf   : > { %v763_v45 = vmax.f32 %v731_v29, 0.0  ;;  %1444 = vmatpush.msrb.mxu2 %v896_v63  ;;  %v821_v6 = vrot.slane %v820_v54, 2 }
  0xe1   : > { %1445 = vmatpush.msrb.mxu2 %v895_v3  ;;  %v822_v34 = vmax.f32 %v820_v54, %v821_v6 }
  0xe3   : > { %v2955_v42 = vpop.f32.mrf.mxu2  ;;  %v2957_v26 = vpop.f32.mrf.mxu3  ;;  %1721 = vmatpush.msra.mxu2 %v1533_v9 }
  0xe4   : > { %v2959_v38 = vpop.f32.mrf.mxu0  ;;  %v2961_v46 = vpop.f32.mrf.mxu1  ;;  %v1121_v55 = vadd.f32 %v2932_v14, %v2955_v42 }
  0xe5   : > { %v733_v19 = vadd.f32 %v2917_v7, %v2959_v38  ;;  %v734_v20 = vadd.f32 %v2924_v10, %v2961_v46  ;;  %v732_v38 = vadd.f32 %v2924_v10, %v2938_v18  ;;  %v789_v46 = vmax.f32 %v787_v36, %v788_v2  ;;  %1722 = vmatpush.msra.mxu2 %v1531_v31 }
  0xe6   : > { %v803_v18 = vmax.f32 %v801_v47, %v802_v24  ;;  %v813_v36 = vmax.f32 %v811_v49, %v812_v28  ;;  %v3070_v47 = vmax.f32 %v1189_v5, %v1190_v32  ;;  %v1122_v49 = vadd.f32 %v2942_v21, %v2957_v26  ;;  %v1292_v32 = vld [vmem:[%s3758_s10 + $0x28] sm:$0xff] }
  0xe7   : > { %v765_v62 = vmax.f32 %v733_v19, 0.0  ;;  %v766_v37 = vmax.f32 %v734_v20, 0.0  ;;  %v764_v59 = vmax.f32 %v732_v38, 0.0  ;;  %v3096_v5 = vmax.f32 %v1196_v27, %v1197_v58  ;;  %1368 = vmatpush.msrb.mxu0 %v1292_v32  ;;  %1723 = vmatpush.msra.mxu2 %v1529_v44 }
  0xe8   : > { %v3084_v53 = vsel %vm1335_vm1, %v803_v18, %v789_v46  ;;  %v814_v2 = vrot.slane %v813_v36, 2  ;;  %v1153_v8 = vmax.f32 %v1121_v55, 0.0  ;;  %v1192_v13 = vrot.slane %v3070_v47, 2  ;;  %v1291_v18 = vld [vmem:[%s3758_s10 + $0x20] sm:$0xff] }
  0xe9   : > { %v825_v1 = vmax.f32 %v763_v45, %v765_v62  ;;  %v832_v42 = vmax.f32 %v764_v59, %v766_v37  ;;  %v914_v37 = vld [vmem:[%s3757_s9 + $0x98] sm:$0xff]  ;;  %v1199_v58 = vrot.slane %v3096_v5, 2  ;;  %1369 = vmatpush.msrb.mxu0 %v1291_v18  ;;  %1724 = vmatpush.msra.mxu2 %v1527_v52  ;;  %v1530_v52 = vld [vmem:[%s3753_s5 + $0xe0] sm:$0xff] }
  0xea   : > { %v3115_v29 = vmax.f32 %v813_v36, %v814_v2  ;;  %v3128_v35 = vmax.f32 %v1151_v16, %v1153_v8  ;;  %v1193_v48 = vmax.f32 %v3070_v47, %v1192_v13  ;;  %v1525_v47 = vld [vmem:[%s3753_s5 + $0xb8] sm:$0xff]  ;;  %v1289_v13 = vld [vmem:[%s3758_s10 + $0x10] sm:$0xff] }
  0xeb   : > { %v2987_v11 = vpop.f32.mrf.mxu2  ;;  %v2989_v15 = vpop.f32.mrf.mxu3  ;;  %v826_v20 = vrot.slane %v825_v1, 4  ;;  %v833_v24 = vrot.slane %v832_v42, 4  ;;  %1725 = vmatpush.msra.mxu2 %v1525_v47  ;;  %v3185_v33 = vmax.f32 %v3096_v5, %v1199_v58  ;;  %v1287_v5 = vld [vmem:[%s3758_s10] sm:$0xff] }
  0xec   : > { %v2993_v22 = vpop.f32.mrf.mxu0  ;;  %v2995_v23 = vpop.f32.mrf.mxu1  ;;  %v1124_v62 = vadd.f32 %v2942_v21, %v2989_v15  ;;  %v1204_v2 = vrot.slane %v3128_v35, 4  ;;  %v1194_v32 = vrot.slane %v1193_v48, 1 }
  0xed   : > { %v735_v19 = vadd.f32 %v2917_v7, %v2993_v22  ;;  %v1152_v22 = vmax.f32 %v1120_v12, 0.0  ;;  %v736_v15 = vadd.f32 %v2924_v10, %v2995_v23  ;;  %v827_v54 = vmax.f32 %v825_v1, %v826_v20  ;;  %v1290_v1 = vld [vmem:[%s3758_s10 + $0x18] sm:$0xff] }
  0xee   : > { %v834_v45 = vmax.f32 %v832_v42, %v833_v24  ;;  %v816_v23 = vrot.slane %v3115_v29, 1  ;;  %v823_v42 = vrot.slane %v822_v34, 1  ;;  %1370 = vmatpush.msrb.mxu0 %v1290_v1 }
  0xef   : > { %v768_v6 = vmax.f32 %v736_v15, 0.0  ;;  %v828_v16 = vrot.slane %v827_v54, 2 }
  0xf0   : > { %1371 = vmatpush.msrb.mxu0 %v1289_v13  ;;  %v1517_v13 = vld [vmem:[%s3753_s5 + $0x78] sm:$0xff] }
  0xf1   : > { %v3199_v58 = vmax.f32 %v827_v54, %v828_v16 }
  0xf3   : > { %v3011_v39 = vpop.f32.mrf.mxu2  ;;  %v3013_v57 = vpop.f32.mrf.mxu3 }
  0xf4   : > { %v3015_v50 = vpop.f32.mrf.mxu0  ;;  %v3017_v51 = vpop.f32.mrf.mxu1  ;;  %v1125_v25 = vadd.f32 %v2932_v14, %v3011_v39  ;;  %v1126_v27 = vadd.f32 %v2942_v21, %v3013_v57  ;;  %v915_v57 = vld [vmem:[%s3757_s9 + $0xa0] sm:$0xff] }
  0xf5   : > { %v737_v26 = vadd.f32 %v2917_v7, %v3015_v50  ;;  %v1154_v50 = vmax.f32 %v1122_v49, 0.0  ;;  %v738_v46 = vadd.f32 %v2924_v10, %v3017_v51  ;;  %v1123_v51 = vadd.f32 %v2932_v14, %v2987_v11  ;;  %1461 = vmatpush.msrb.mxu3 %v915_v57  ;;  %v1288_v57 = vld [vmem:[%s3758_s10 + $0x8] sm:$0xff] }
  0xf6   : > { %v767_v11 = vmax.f32 %v735_v19, 0.0  ;;  %v1157_v59 = vmax.f32 %v1125_v25, 0.0  ;;  %v1158_v55 = vmax.f32 %v1126_v27, 0.0  ;;  %v1523_v27 = vld [vmem:[%s3753_s5 + $0xa8] sm:$0xff]  ;;  %1372 = vmatpush.msrb.mxu0 %v1288_v57 }
  0xf7   : > { %v769_v38 = vmax.f32 %v737_v26, 0.0  ;;  %v1210_v36 = vmax.f32 %v1152_v22, %v1154_v50  ;;  %1462 = vmatpush.msrb.mxu3 %v914_v37  ;;  %v770_v63 = vmax.f32 %v738_v46, 0.0  ;;  %v1155_v12 = vmax.f32 %v1123_v51, 0.0  ;;  %1726 = vmatpush.msra.mxu2 %v1523_v27 }
  0xf8   : > { %v1156_v26 = vmax.f32 %v1124_v62, 0.0  ;;  %v835_v50 = vrot.slane %v834_v45, 2  ;;  %v817_v51 = vmax.f32 %v3115_v29, %v816_v23  ;;  %v824_v62 = vmax.f32 %v822_v34, %v823_v42  ;;  %1373 = vmatpush.msrb.mxu0 %v1287_v5 }
  0xf9   : > { %v839_v49 = vmax.f32 %v767_v11, %v769_v38  ;;  %v1211_v3 = vrot.slane %v1210_v36, 4  ;;  %v3166_v19 = vmax.f32 %v1155_v12, %v1157_v59  ;;  %v846_v22 = vmax.f32 %v768_v6, %v770_v63 }
  0xfa   : > { %v3168_v20 = vmax.f32 %v1156_v26, %v1158_v55  ;;  %v3201_v29 = vmax.f32 %v834_v45, %v835_v50  ;;  %v3211_v45 = vmax.f32 %v1193_v48, %v1194_v32  ;;  %v1201_v55 = vrot.slane %v3185_v33, 1 }
  0xfb   : > { %v3057_v40 = vpop.f32.mrf.mxu2  ;;  %v3059_v17 = vpop.f32.mrf.mxu3  ;;  %v840_v31 = vrot.slane %v839_v49, 4  ;;  %v3194_v37 = vmax.f32 %v1210_v36, %v1211_v3  ;;  %v1218_v34 = vrot.slane %v3166_v19, 4  ;;  %v1519_v36 = vld [vmem:[%s3753_s5 + $0x88] sm:$0xff]  ;;  %v847_v44 = vrot.slane %v846_v22, 4 }
  0xfc   : > { %v3061_v41 = vpop.f32.mrf.mxu0  ;;  %v3063_v43 = vpop.f32.mrf.mxu1  ;;  %v1225_v11 = vrot.slane %v3168_v20, 4  ;;  %v3219_v23 = vsel %vm1337_vm2, %v817_v51, %v3084_v53  ;;  %v1306_v53 = vld [vmem:[%s3758_s10 + $0x98] sm:$0xff]  ;;  %v830_v12 = vrot.slane %v3199_v58, 1  ;;  %v837_v26 = vrot.slane %v3201_v29, 1 }
  0xfd   : > { %v739_v38 = vadd.f32 %v2917_v7, %v3061_v41  ;;  %v740_v46 = vadd.f32 %v2924_v10, %v3063_v43  ;;  %v1521_v41 = vld [vmem:[%s3753_s5 + $0x98] sm:$0xff]  ;;  %v3192_v43 = vmax.f32 %v3128_v35, %v1204_v2  ;;  %v1532_v35 = vld [vmem:[%s3753_s5 + $0xf0] sm:$0xff]  ;;  %v841_v15 = vmax.f32 %v839_v49, %v840_v31  ;;  %1390 = vmatpush.msrb.mxu1 %v1306_v53 }
  0xfe   : > { %1727 = vmatpush.msra.mxu2 %v1521_v41  ;;  %1591 = vmatpush.msra.mxu0 %v1532_v35  ;;  %v3223_v49 = vsel %vm1337_vm2, %v824_v62, %v3094_v4  ;;  %v1213_v48 = vrot.slane %v3194_v37, 2  ;;  %v913_v2 = vld [vmem:[%s3757_s9 + $0x90] sm:$0xff]  ;;  %v912_v4 = vld [vmem:[%s3757_s9 + $0x88] sm:$0xff]  ;;  %v3253_v16 = vmax.f32 %v3166_v19, %v1218_v34  ;;  %v3256_v50 = vmax.f32 %v3168_v20, %v1225_v11 }
  0xff   : > { %v771_v59 = vmax.f32 %v739_v38, 0.0  ;;  %v772_v54 = vmax.f32 %v740_v46, 0.0  ;;  %v1206_v63 = vrot.slane %v3192_v43, 2  ;;  %1463 = vmatpush.msrb.mxu3 %v913_v2  ;;  %v842_v27 = vrot.slane %v841_v15, 2 }
 0x100   : > { %1728 = vmatpush.msra.mxu2 %v1519_v36  ;;  %v848_v31 = vmax.f32 %v846_v22, %v847_v44  ;;  %1592 = vmatpush.msra.mxu0 %v1530_v52  ;;  %v1515_v22 = vld [vmem:[%s3753_s5 + $0x68] sm:$0xff]  ;;  %v1127_v32 = vadd.f32 %v2932_v14, %v3057_v40  ;;  %v1128_v51 = vadd.f32 %v2942_v21, %v3059_v17  ;;  %v911_v40 = vld [vmem:[%s3757_s9 + $0x80] sm:$0xff]  ;;  %v1513_v17 = vld [vmem:[%s3753_s5 + $0x58] sm:$0xff] }
 0x101   : > { %1464 = vmatpush.msrb.mxu3 %v912_v4  ;;  %v3285_v34 = vmax.f32 %v3192_v43, %v1206_v63  ;;  %v3288_v11 = vmax.f32 %v3194_v37, %v1213_v48  ;;  %v843_v35 = vmax.f32 %v841_v15, %v842_v27  ;;  %v1524_v44 = vld [vmem:[%s3753_s5 + $0xb0] sm:$0xff]  ;;  %v1511_v43 = vld [vmem:[%s3753_s5 + $0x48] sm:$0xff]  ;;  %v1541_v37 = vld [vmem:[%s3753_s5 + $0x138] sm:$0xff]  ;;  %v831_v15 = vmax.f32 %v3199_v58, %v830_v12 }
 0x102   : > { %1729 = vmatpush.msra.mxu2 %v1517_v13  ;;  %v849_v36 = vrot.slane %v848_v31, 2  ;;  %v838_v63 = vmax.f32 %v3201_v29, %v837_v26  ;;  %v1220_v48 = vrot.slane %v3253_v16, 2  ;;  %v1522_v4 = vld [vmem:[%s3753_s5 + $0xa0] sm:$0xff]  ;;  %v1509_v58 = vld [vmem:[%s3753_s5 + $0x38] sm:$0xff]  ;;  %v1539_v29 = vld [vmem:[%s3753_s5 + $0x128] sm:$0xff] }
 0x103   : > { %v3108_v28 = vpop.f32.mrf.mxu2  ;;  %v3110_v30 = vpop.f32.mrf.mxu3  ;;  %1465 = vmatpush.msrb.mxu3 %v911_v40  ;;  %v1304_v40 = vld [vmem:[%s3758_s10 + $0x88] sm:$0xff] }
 0x104   : > { %v633_v61 = vpop.f32.mrf.mxu0  ;;  %v698_v39 = vpop.f32.mrf.mxu1  ;;  %v1130_v57 = vadd.f32 %v2942_v21, %v3110_v30  ;;  %v1526_v30 = vld [vmem:[%s3753_s5 + $0xc0] sm:$0xff]  ;;  %1730 = vmatpush.msra.mxu2 %v1515_v22  ;;  %v3313_v12 = vmax.f32 %v848_v31, %v849_v36  ;;  %v1507_v22 = vld [vmem:[%s3753_s5 + $0x28] sm:$0xff] }
 0x105   : > { %v741_v8 = vadd.f32 %v2917_v7, %v633_v61  ;;  %v742_v9 = vadd.f32 %v2924_v10, %v698_v39  ;;  %1798 = vmatpush.msra.mxu3 %v1541_v37 }
 0x106   : > { %1731 = vmatpush.msra.mxu2 %v1513_v17  ;;  %v1535_v17 = vld [vmem:[%s3753_s5 + $0x108] sm:$0xff] }
 0x107   : > { %v773_v18 = vmax.f32 %v741_v8, 0.0  ;;  %v774_v56 = vmax.f32 %v742_v9, 0.0  ;;  %v1305_v9 = vld [vmem:[%s3758_s10 + $0x90] sm:$0xff]  ;;  %1799 = vmatpush.msra.mxu3 %v1539_v29 }
 0x108   : > { %1391 = vmatpush.msrb.mxu1 %v1305_v9  ;;  %v1160_v9 = vmax.f32 %v1128_v51, 0.0  ;;  %1732 = vmatpush.msra.mxu2 %v1511_v43 }
 0x109   : > { %v853_v1 = vmax.f32 %v771_v59, %v773_v18  ;;  %v3227_v42 = vmax.f32 %v772_v54, %v774_v56  ;;  %v1162_v54 = vmax.f32 %v1130_v57, 0.0 }
 0x10a   : > { %1733 = vmatpush.msra.mxu2 %v1509_v58  ;;  %1392 = vmatpush.msrb.mxu1 %v1304_v40 }
 0x10b   : > { %v3170_v24 = vpop.f32.mrf.mxu2  ;;  %v3172_v25 = vpop.f32.mrf.mxu3  ;;  %v854_v62 = vrot.slane %v853_v1, 4 }
 0x10c   : > { %v636_v61 = vpop.f32.mrf.mxu0  ;;  %v701_v39 = vpop.f32.mrf.mxu1  ;;  %1734 = vmatpush.msra.mxu2 %v1507_v22 }
 0x10d   : > { %v743_v47 = vadd.f32 %v2917_v7, %v636_v61  ;;  %v744_v3 = vadd.f32 %v2924_v10, %v701_v39  ;;  %v1528_v61 = vld [vmem:[%s3753_s5 + $0xd0] sm:$0xff]  ;;  %v1129_v39 = vadd.f32 %v2932_v14, %v3108_v28  ;;  %v861_v28 = vrot.slane %v3227_v42, 4 }
 0x10e   : > { %1593 = vmatpush.msra.mxu0 %v1528_v61  ;;  %v855_v53 = vmax.f32 %v853_v1, %v854_v62  ;;  %v844_v1 = vrot.slane %v843_v35, 1  ;;  %v1131_v62 = vadd.f32 %v2932_v14, %v3170_v24 }
 0x10f   : > { %v775_v41 = vmax.f32 %v743_v47, 0.0  ;;  %v776_v18 = vmax.f32 %v744_v3, 0.0  ;;  %v1161_v59 = vmax.f32 %v1129_v39, 0.0  ;;  %v1227_v47 = vrot.slane %v3256_v50, 2 }
 0x110   : > { %1594 = vmatpush.msra.mxu0 %v1526_v30  ;;  %v1159_v3 = vmax.f32 %v1127_v32, 0.0  ;;  %v862_v13 = vmax.f32 %v3227_v42, %v861_v28  ;;  %v1520_v42 = vld [vmem:[%s3753_s5 + $0x90] sm:$0xff]  ;;  %v1537_v32 = vld [vmem:[%s3753_s5 + $0x118] sm:$0xff]  ;;  %v856_v51 = vrot.slane %v855_v53, 2  ;;  %v3336_v28 = vsel %vm1339_vm3, %v831_v15, %v3219_v23  ;;  %v1514_v15 = vld [vmem:[%s3753_s5 + $0x60] sm:$0xff] }
 0x111   : > { %v3346_v30 = vmax.f32 %v3253_v16, %v1220_v48  ;;  %v1132_v23 = vadd.f32 %v2942_v21, %v3172_v25  ;;  %v851_v16 = vrot.slane %v3313_v12, 1  ;;  %1800 = vmatpush.msra.mxu3 %v1537_v32  ;;  %v1303_v25 = vld [vmem:[%s3758_s10 + $0x80] sm:$0xff] }
 0x112   : > { %1595 = vmatpush.msra.mxu0 %v1524_v44  ;;  %v3318_v57 = vmax.f32 %v1159_v3, %v1161_v59  ;;  %v863_v24 = vrot.slane %v862_v13, 2  ;;  %1393 = vmatpush.msrb.mxu1 %v1303_v25  ;;  %v1510_v32 = vld [vmem:[%s3753_s5 + $0x40] sm:$0xff]  ;;  %v1508_v25 = vld [vmem:[%s3753_s5 + $0x30] sm:$0xff] }
 0x113   : > { %v3242_v6 = vpop.f32.mrf.mxu2  ;;  %v3244_v8 = vpop.f32.mrf.mxu3  ;;  %1801 = vmatpush.msra.mxu3 %v1535_v17  ;;  %v1164_v48 = vmax.f32 %v1132_v23, 0.0  ;;  %v852_v23 = vmax.f32 %v3313_v12, %v851_v16 }
 0x114   : > { %v639_v38 = vpop.f32.mrf.mxu0  ;;  %v704_v46 = vpop.f32.mrf.mxu1  ;;  %v1134_v31 = vadd.f32 %v2942_v21, %v3244_v8  ;;  %1596 = vmatpush.msra.mxu0 %v1522_v4  ;;  %v1518_v8 = vld [vmem:[%s3753_s5 + $0x80] sm:$0xff] }
 0x115   : > { %v745_v19 = vadd.f32 %v2917_v7, %v639_v38  ;;  %v746_v20 = vadd.f32 %v2924_v10, %v704_v46 }
 0x116   : > { %1597 = vmatpush.msra.mxu0 %v1520_v42  ;;  %v1166_v59 = vmax.f32 %v1134_v31, 0.0 }
 0x117   : > { %v777_v56 = vmax.f32 %v745_v19, 0.0  ;;  %v778_v5 = vmax.f32 %v746_v20, 0.0  ;;  %v3320_v19 = vmax.f32 %v1160_v9, %v1162_v54  ;;  %v1133_v20 = vadd.f32 %v2932_v14, %v3242_v6  ;;  %v1503_v54 = vld [vmem:[%s3753_s5 + $0x8] sm:$0xff] }
 0x118   : > { %v3340_v6 = vsel %vm1339_vm3, %v838_v63, %v3223_v49  ;;  %v1505_v49 = vld [vmem:[%s3753_s5 + $0x18] sm:$0xff]  ;;  %1598 = vmatpush.msra.mxu0 %v1518_v8  ;;  %v3383_v63 = vmax.f32 %v862_v13, %v863_v24  ;;  %v1512_v13 = vld [vmem:[%s3753_s5 + $0x50] sm:$0xff] }
 0x119   : > { %v867_v52 = vmax.f32 %v775_v41, %v777_v56  ;;  %v874_v2 = vmax.f32 %v776_v18, %v778_v5  ;;  %v3349_v41 = vmax.f32 %v3256_v50, %v1227_v47  ;;  %v1516_v18 = vld [vmem:[%s3753_s5 + $0x70] sm:$0xff]  ;;  %v3359_v56 = vmax.f32 %v843_v35, %v844_v1  ;;  %1735 = vmatpush.msra.mxu2 %v1505_v49 }
 0x11a   : > { %v1232_v35 = vrot.slane %v3318_v57, 4  ;;  %v1239_v36 = vrot.slane %v3320_v19, 4  ;;  %v1165_v44 = vmax.f32 %v1133_v20, 0.0  ;;  %1599 = vmatpush.msra.mxu0 %v1516_v18  ;;  %v865_v16 = vrot.slane %v3383_v63, 1 }
 0x11b   : > { %v1028_v27 = vpop.f32.mrf.mxu2  ;;  %v1093_v38 = vpop.f32.mrf.mxu3  ;;  %v868_v26 = vrot.slane %v867_v52, 4  ;;  %v875_v46 = vrot.slane %v874_v2, 4  ;;  %1736 = vmatpush.msra.mxu2 %v1503_v54 }
 0x11c   : > { %v642_v61 = vpop.f32.mrf.mxu0  ;;  %v707_v39 = vpop.f32.mrf.mxu1  ;;  %v1135_v43 = vadd.f32 %v2932_v14, %v1028_v27  ;;  %v1136_v37 = vadd.f32 %v2942_v21, %v1093_v38  ;;  %1600 = vmatpush.msra.mxu0 %v1514_v15  ;;  %v1233_v49 = vmax.f32 %v3318_v57, %v1232_v35  ;;  %v3412_v12 = vmax.f32 %v3320_v19, %v1239_v36  ;;  %v1534_v19 = vld [vmem:[%s3753_s5 + $0x100] sm:$0xff] }
 0x11d   : > { %v869_v5 = vmax.f32 %v867_v52, %v868_v26  ;;  %v876_v50 = vmax.f32 %v874_v2, %v875_v46  ;;  %v3376_v52 = vmax.f32 %v855_v53, %v856_v51  ;;  %v1163_v2 = vmax.f32 %v1131_v62, 0.0 }
 0x11e   : > { %v747_v4 = vadd.f32 %v2917_v7, %v642_v61  ;;  %v748_v47 = vadd.f32 %v2924_v10, %v707_v39  ;;  %v1252_v46 = vmax.f32 %v1164_v48, %v1166_v59  ;;  %v1167_v42 = vmax.f32 %v1135_v43, 0.0  ;;  %1601 = vmatpush.msra.mxu0 %v1512_v13 }
 0x11f   : > { %v870_v9 = vrot.slane %v869_v5, 2  ;;  %v877_v27 = vrot.slane %v876_v50, 2  ;;  %v1245_v26 = vmax.f32 %v1163_v2, %v1165_v44  ;;  %v1168_v20 = vmax.f32 %v1136_v37, 0.0  ;;  %v1536_v2 = vld [vmem:[%s3753_s5 + $0x110] sm:$0xff] }
 0x120   : > { %v779_v51 = vmax.f32 %v747_v4, 0.0  ;;  %v780_v62 = vmax.f32 %v748_v47, 0.0  ;;  %1602 = vmatpush.msra.mxu0 %v1510_v32  ;;  %v858_v57 = vrot.slane %v3376_v52, 1  ;;  %v1253_v35 = vrot.slane %v1252_v46, 4 }
 0x121   : > { %v871_v18 = vmax.f32 %v869_v5, %v870_v9  ;;  %v878_v40 = vmax.f32 %v876_v50, %v877_v27  ;;  %v1506_v5 = vld [vmem:[%s3753_s5 + $0x20] sm:$0xff]  ;;  %v1246_v50 = vrot.slane %v1245_v26, 4  ;;  %v1234_v36 = vrot.slane %v1233_v49, 2 }
 0x122   : > { %1603 = vmatpush.msra.mxu0 %v1508_v25  ;;  %v866_v13 = vmax.f32 %v3383_v63, %v865_v16 }
 0x123   : > { %v1031_v53 = vpop.f32.mrf.mxu2  ;;  %v1096_v3 = vpop.f32.mrf.mxu3  ;;  %v872_v4 = vrot.slane %v871_v18, 1  ;;  %v879_v47 = vrot.slane %v878_v40, 1 }
 0x124   : > { %v1137_v38 = vadd.f32 %v2932_v14, %v1031_v53  ;;  %v1138_v58 = vadd.f32 %v2942_v21, %v1096_v3  ;;  %v645_v29 = vpop.f32.mrf.mxu0  ;;  %v710_v1 = vpop.f32.mrf.mxu1  ;;  %v1417_v53 = vsel %vm1341_vm4, %v3359_v56, %v3336_v28  ;;  %v1504_v3 = vld [vmem:[%s3753_s5 + $0x10] sm:$0xff]  ;;  %1604 = vmatpush.msra.mxu0 %v1506_v5  ;;  %v1502_v28 = vld [vmem:[%s3753_s5] sm:$0xff]  ;;  %v1247_v56 = vmax.f32 %v1245_v26, %v1246_v50 }
 0x125   : > { %v749_v61 = vadd.f32 %v2917_v7, %v645_v29  ;;  %v750_v39 = vadd.f32 %v2924_v10, %v710_v1  ;;  %v1540_v7 = vld [vmem:[%s3753_s5 + $0x130] sm:$0xff]  ;;  %v1538_v10 = vld [vmem:[%s3753_s5 + $0x120] sm:$0xff]  ;;  %v1241_v29 = vrot.slane %v3412_v12, 2  ;;  %v859_v1 = vmax.f32 %v3376_v52, %v858_v57 }
 0x126   : > { %v1169_v31 = vmax.f32 %v1137_v38, 0.0  ;;  %v1170_v22 = vmax.f32 %v1138_v58, 0.0  ;;  %1668 = vmatpush.msra.mxu1 %v1540_v7  ;;  %1605 = vmatpush.msra.mxu0 %v1504_v3  ;;  %v880_v52 = vmax.f32 %v878_v40, %v879_v47  ;;  %v1215_v47 = vrot.slane %v3288_v11, 1 }
 0x127   : > { %v781_v8 = vmax.f32 %v749_v61, 0.0  ;;  %v782_v24 = vmax.f32 %v750_v39, 0.0  ;;  %v1424_v61 = vsel %vm1341_vm4, %v852_v23, %v3340_v6  ;;  %v1254_v39 = vmax.f32 %v1252_v46, %v1253_v35 }
 0x128   : > { %v1259_v17 = vmax.f32 %v1167_v42, %v1169_v31  ;;  %v1266_v44 = vmax.f32 %v1168_v20, %v1170_v22  ;;  %1669 = vmatpush.msra.mxu1 %v1538_v10  ;;  %v3436_v31 = vmax.f32 %v1233_v49, %v1234_v36  ;;  %v873_v22 = vmax.f32 %v871_v18, %v872_v4 }
 0x129   : > { %v881_v59 = vmax.f32 %v779_v51, %v781_v8  ;;  %v888_v54 = vmax.f32 %v780_v62, %v782_v24  ;;  %1606 = vmatpush.msra.mxu0 %v1502_v28  ;;  %v1418_v26 = vsel %vm1343_vm5, %v859_v1, %v1417_v53  ;;  %v1425_v46 = vsel %vm1343_vm5, %v866_v13, %v1424_v61 }
 0x12a   : > { %1670 = vmatpush.msra.mxu1 %v1536_v2  ;;  %v1260_v9 = vrot.slane %v1259_v17, 4  ;;  %v1267_v27 = vrot.slane %v1266_v44, 4  ;;  %v1248_v24 = vrot.slane %v1247_v56, 2  ;;  %v1255_v7 = vrot.slane %v1254_v39, 2 }
 0x12b   : > { %v882_v43 = vrot.slane %v881_v59, 4  ;;  %v889_v37 = vrot.slane %v888_v54, 4  ;;  %v1034_v15 = vpop.f32.mrf.mxu2  ;;  %v1099_v48 = vpop.f32.mrf.mxu3  ;;  %v1202_v4 = vmax.f32 %v3185_v33, %v1201_v55  ;;  %v1222_v3 = vrot.slane %v3346_v30, 1 }
 0x12c   : > { %1671 = vmatpush.msra.mxu1 %v1534_v19  ;;  %v1261_v32 = vmax.f32 %v1259_v17, %v1260_v9  ;;  %v1268_v63 = vmax.f32 %v1266_v44, %v1267_v27  ;;  %v1139_v6 = vadd.f32 %v2932_v14, %v1034_v15  ;;  %v1140_v8 = vadd.f32 %v2942_v21, %v1099_v48 }
 0x12d   : > { %v883_v38 = vmax.f32 %v881_v59, %v882_v43  ;;  %v890_v58 = vmax.f32 %v888_v54, %v889_v37  ;;  %v1419_v17 = vsel %vm1345_vm6, %v873_v22, %v1418_v26  ;;  %v1426_v44 = vsel %vm1345_vm6, %v880_v52, %v1425_v46  ;;  %v1471_v22 = vld [vmem:[%s3458_s16 + $0x8] sm:$0xff] }
 0x12e   : > { %v1262_v59 = vrot.slane %v1261_v32, 2  ;;  %v1269_v54 = vrot.slane %v1268_v63, 2  ;;  %v1171_v16 = vmax.f32 %v1139_v6, 0.0  ;;  %v1172_v5 = vmax.f32 %v1140_v8, 0.0 }
 0x12f   : > { %v884_v42 = vrot.slane %v883_v38, 2  ;;  %v891_v20 = vrot.slane %v890_v58, 2  ;;  %v1242_v43 = vmax.f32 %v3412_v12, %v1241_v29  ;;  %v1249_v37 = vmax.f32 %v1247_v56, %v1248_v24 }
 0x130   : > { %v1208_v15 = vrot.slane %v3285_v34, 1  ;;  %v1256_v48 = vmax.f32 %v1254_v39, %v1255_v7  ;;  %v1263_v53 = vmax.f32 %v1261_v32, %v1262_v59  ;;  %v1270_v12 = vmax.f32 %v1268_v63, %v1269_v54  ;;  %v1472_v59 = vld [vmem:[%s3458_s16 + $0x10] sm:$0xff]  ;;  %v1473_v54 = vld [vmem:[%s3458_s16 + $0x18] sm:$0xff] }
 0x131   : > { %v885_v51 = vmax.f32 %v883_v38, %v884_v42  ;;  %v892_v62 = vmax.f32 %v890_v58, %v891_v20  ;;  %v1229_v9 = vrot.slane %v3349_v41, 1  ;;  %v1336_v33 = vsel %vm1335_vm1, %v3211_v45, %v3079_v60  ;;  %v1470_v20 = vld [vmem:[%s3458_s16] sm:$0xff] }
 0x132   : > { %v1236_v55 = vrot.slane %v3436_v31, 1  ;;  %v1243_v58 = vrot.slane %v1242_v43, 1  ;;  %v1250_v29 = vrot.slane %v1249_v37, 1  ;;  %v1209_v1 = vmax.f32 %v3285_v34, %v1208_v15  ;;  %v1482_v15 = vld [vmem:[%s3458_s16 + $0x60] sm:$0xff] }
 0x133   : > { %v1037_v10 = vpop.f32.mrf.mxu2  ;;  %v1102_v23 = vpop.f32.mrf.mxu3  ;;  %v886_v49 = vrot.slane %v885_v51, 1  ;;  %v893_v18 = vrot.slane %v892_v62, 1  ;;  %v1257_v13 = vrot.slane %v1256_v48, 1  ;;  %v1216_v56 = vmax.f32 %v3288_v11, %v1215_v47  ;;  %v1487_v47 = vld [vmem:[%s3458_s16 + $0x88] sm:$0xff] }
 0x134   : > { %v1141_v40 = vadd.f32 %v2932_v14, %v1037_v10  ;;  %v1142_v25 = vadd.f32 %v2942_v21, %v1102_v23  ;;  %v1264_v39 = vrot.slane %v1263_v53, 1  ;;  %v1271_v42 = vrot.slane %v1270_v12, 1 }
 0x135   : > { %v887_v2 = vmax.f32 %v885_v51, %v886_v49  ;;  %v894_v57 = vmax.f32 %v892_v62, %v893_v18  ;;  %v1223_v52 = vmax.f32 %v3346_v30, %v1222_v3  ;;  %v1230_v60 = vmax.f32 %v3349_v41, %v1229_v9  ;;  %v1490_v3 = vld [vmem:[%s3458_s16 + $0xa0] sm:$0xff]  ;;  %v1491_v9 = vld [vmem:[%s3458_s16 + $0xa8] sm:$0xff] }
 0x136   : > { %v1173_v50 = vmax.f32 %v1141_v40, 0.0  ;;  %v1174_v35 = vmax.f32 %v1142_v25, 0.0  ;;  %v1349_v63 = vsel %vm1335_vm1, %v1202_v4, %v3081_v0  ;;  %v1237_v34 = vmax.f32 %v3436_v31, %v1236_v55  ;;  %v1486_v4 = vld [vmem:[%s3458_s16 + $0x80] sm:$0xff]  ;;  %v1495_v55 = vld [vmem:[%s3458_s16 + $0xc8] sm:$0xff] }
 0x137   : > { %v1420_v14 = vsel %vm1347_vm7, %v887_v2, %v1419_v17  ;;  %v1427_v21 = vsel %vm1347_vm7, %v894_v57, %v1426_v44  ;;  %v1244_v51 = vmax.f32 %v1242_v43, %v1243_v58  ;;  %v1251_v62 = vmax.f32 %v1249_v37, %v1250_v29  ;;  %v1478_v43 = vld [vmem:[%s3458_s16 + $0x40] sm:$0xff]  ;;  %v1479_v37 = vld [vmem:[%s3458_s16 + $0x48] sm:$0xff]  ;;  %v1496_v58 = vld [vmem:[%s3458_s16 + $0xd0] sm:$0xff] }
 0x138   : > { %v1273_v19 = vmax.f32 %v1171_v16, %v1173_v50  ;;  %v1280_v36 = vmax.f32 %v1172_v5, %v1174_v35  ;;  %1446 = vmatmul.f32.vlgmr.msrb.gmra.mxu2 %v1420_v14  ;;  %1466 = vmatmul.f32.vlgmr.msrb.gmra.mxu3 %v1427_v21  ;;  %v1258_v6 = vmax.f32 %v1256_v48, %v1257_v13  ;;  %v1474_v16 = vld [vmem:[%s3458_s16 + $0x20] sm:$0xff]  ;;  %v1475_v5 = vld [vmem:[%s3458_s16 + $0x28] sm:$0xff]  ;;  %v1476_v50 = vld [vmem:[%s3458_s16 + $0x30] sm:$0xff] }
 0x139   : > { %v1265_v26 = vmax.f32 %v1263_v53, %v1264_v39  ;;  %v1338_v30 = vsel %vm1337_vm2, %v1209_v1, %v1336_v33  ;;  %v1272_v41 = vmax.f32 %v1270_v12, %v1271_v42  ;;  %v1350_v46 = vsel %vm1337_vm2, %v1216_v56, %v1349_v63  ;;  %v1477_v35 = vld [vmem:[%s3458_s16 + $0x38] sm:$0xff]  ;;  %v1480_v14 = vld [vmem:[%s3458_s16 + $0x50] sm:$0xff]  ;;  %v1483_v48 = vld [vmem:[%s3458_s16 + $0x68] sm:$0xff] }
 0x13a   : > { %v1274_v27 = vrot.slane %v1273_v19, 4  ;;  %v1281_v38 = vrot.slane %v1280_v36, 4  ;;  %v1340_v0 = vsel %vm1339_vm3, %v1223_v52, %v1338_v30  ;;  %v1351_v7 = vsel %vm1339_vm3, %v1230_v60, %v1350_v46  ;;  %v1481_v21 = vld [vmem:[%s3458_s16 + $0x58] sm:$0xff]  ;;  %v1488_v53 = vld [vmem:[%s3458_s16 + $0x90] sm:$0xff]  ;;  %v1494_v33 = vld [vmem:[%s3458_s16 + $0xc0] sm:$0xff] }
 0x13b   : > { %v1342_v10 = vsel %vm1341_vm4, %v1237_v34, %v1340_v0  ;;  %v1352_v23 = vsel %vm1341_vm4, %v1244_v51, %v1351_v7  ;;  %v1489_v12 = vld [vmem:[%s3458_s16 + $0x98] sm:$0xff]  ;;  %v1498_v1 = vld [vmem:[%s3458_s16 + $0xe0] sm:$0xff]  ;;  %v1499_v13 = vld [vmem:[%s3458_s16 + $0xe8] sm:$0xff] }
 0x13c   : > { %v1275_v61 = vmax.f32 %v1273_v19, %v1274_v27  ;;  %v1282_v28 = vmax.f32 %v1280_v36, %v1281_v38  ;;  %v1344_v18 = vsel %vm1343_vm5, %v1251_v62, %v1342_v10  ;;  %v1353_v25 = vsel %vm1343_vm5, %v1258_v6, %v1352_v23  ;;  %v1484_v19 = vld [vmem:[%s3458_s16 + $0x70] sm:$0xff]  ;;  %v1485_v36 = vld [vmem:[%s3458_s16 + $0x78] sm:$0xff] }
 0x13d   : > { %v1346_v17 = vsel %vm1345_vm6, %v1265_v26, %v1344_v18  ;;  %v1354_v44 = vsel %vm1345_vm6, %v1272_v41, %v1353_v25  ;;  %v1492_v27 = vld [vmem:[%s3458_s16 + $0xb0] sm:$0xff]  ;;  %v1493_v38 = vld [vmem:[%s3458_s16 + $0xb8] sm:$0xff] }
 0x13e   : > { %v1276_v45 = vrot.slane %v1275_v61, 2  ;;  %v1283_v32 = vrot.slane %v1282_v28, 2  ;;  %v1497_v29 = vld [vmem:[%s3458_s16 + $0xd8] sm:$0xff]  ;;  %v2063_v10 = vld [vmem:[%s3759_s11 + $0xf0] sm:$0xff] }
 0x13f   : > { %v2064_v34 = vld [vmem:[%s3759_s11 + $0xf8] sm:$0xff]  ;;  %v2047_v23 = vld [vmem:[%s3759_s11 + $0x70] sm:$0xff] }
 0x140   : > { %v1277_v11 = vmax.f32 %v1275_v61, %v1276_v45  ;;  %v1284_v8 = vmax.f32 %v1282_v28, %v1283_v32  ;;  %1737 = vmatmul.f32.vlgmr.msra.gmra.mxu2 %v1470_v20  ;;  %2305 = vmatmul.msk.f32.vlgmr.msra.gmra.mxu3 %vm1542_vm8, %v1471_v22  ;;  %v1500_v61 = vld [vmem:[%s3458_s16 + $0xf0] sm:$0xff]  ;;  %v1501_v28 = vld [vmem:[%s3458_s16 + $0xf8] sm:$0xff]  ;;  %v1851_v32 = vld [vmem:[%s3756_s8] sm:$0x3] }
 0x141   : > { %v2048_v51 = vld [vmem:[%s3759_s11 + $0x78] sm:$0xff]  ;;  %v3558_v62 = vperm.slane %v1851_v32, 1  ;;  %2117 = vmatpush.msrb.mxu3 %v2064_v34 }
 0x142   : > { %v1278_v24 = vrot.slane %v1277_v11, 1  ;;  %v1285_v31 = vrot.slane %v1284_v8, 1  ;;  %v2044_v34 = vld [vmem:[%s3759_s11 + $0x58] sm:$0xff] }
 0x143   : > { %2118 = vmatpush.msrb.mxu3 %v2063_v10 }
 0x144   : > { %v1279_v49 = vmax.f32 %v1277_v11, %v1278_v24  ;;  %v1286_v40 = vmax.f32 %v1284_v8, %v1285_v31 }
 0x146   : > { %v1348_v2 = vsel %vm1347_vm7, %v1279_v49, %v1346_v17  ;;  %v1355_v57 = vsel %vm1347_vm7, %v1286_v40, %v1354_v44  ;;  %v3570_v49 = vperm.slane %v1851_v32, 0 }
 0x147   : > { %1374 = vmatmul.f32.vlgmr.msrb.gmra.mxu0 %v1348_v2  ;;  %1394 = vmatmul.f32.vlgmr.msrb.gmra.mxu1 %v1355_v57 }
 0x148   : > { %1740 = vmatmul.f32.gmra.mxu2 %v1472_v59  ;;  %2306 = vmatmul.msk.f32.gmra.mxu3 %vm1542_vm8, %v1473_v54 }
 0x149   : > { %2097 = vmatpush.msrb.mxu1 %v2048_v51 }
 0x14b   : > { %2098 = vmatpush.msrb.mxu1 %v2047_v23 }
 0x14f   : > { %1607 = vmatmul.f32.vlgmr.msra.gmra.mxu0 %v1470_v20  ;;  %2289 = vmatmul.msk.f32.vlgmr.msra.gmra.mxu1 %vm1542_vm8, %v1471_v22 }
 0x150   : > { %1743 = vmatmul.f32.gmra.mxu2 %v1474_v16  ;;  %2307 = vmatmul.msk.f32.gmra.mxu3 %vm1542_vm8, %v1475_v5 }
 0x157   : > { %1610 = vmatmul.f32.gmra.mxu0 %v1472_v59  ;;  %2290 = vmatmul.msk.f32.gmra.mxu1 %vm1542_vm8, %v1473_v54 }
 0x158   : > { %1746 = vmatmul.f32.gmra.mxu2 %v1476_v50  ;;  %2308 = vmatmul.msk.f32.gmra.mxu3 %vm1542_vm8, %v1477_v35 }
 0x15f   : > { %1613 = vmatmul.f32.gmra.mxu0 %v1474_v16  ;;  %2291 = vmatmul.msk.f32.gmra.mxu1 %vm1542_vm8, %v1475_v5 }
 0x160   : > { %1749 = vmatmul.f32.gmra.mxu2 %v1478_v43  ;;  %2309 = vmatmul.msk.f32.gmra.mxu3 %vm1542_vm8, %v1479_v37 }
 0x167   : > { %1616 = vmatmul.f32.gmra.mxu0 %v1476_v50  ;;  %2292 = vmatmul.msk.f32.gmra.mxu1 %vm1542_vm8, %v1477_v35  ;;  %v2062_v50 = vld [vmem:[%s3759_s11 + $0xe8] sm:$0xff] }
 0x168   : > { %1752 = vmatmul.f32.gmra.mxu2 %v1480_v14  ;;  %2310 = vmatmul.msk.f32.gmra.mxu3 %vm1542_vm8, %v1481_v21  ;;  %v2046_v35 = vld [vmem:[%s3759_s11 + $0x68] sm:$0xff] }
 0x169   : > { %2119 = vmatpush.msrb.mxu3 %v2062_v50  ;;  %2099 = vmatpush.msrb.mxu1 %v2046_v35 }
 0x16f   : > { %1619 = vmatmul.f32.gmra.mxu0 %v1478_v43  ;;  %2293 = vmatmul.msk.f32.gmra.mxu1 %vm1542_vm8, %v1479_v37 }
 0x170   : > { %1755 = vmatmul.f32.gmra.mxu2 %v1482_v15  ;;  %2311 = vmatmul.msk.f32.gmra.mxu3 %vm1542_vm8, %v1483_v48 }
 0x177   : > { %1622 = vmatmul.f32.gmra.mxu0 %v1480_v14  ;;  %2294 = vmatmul.msk.f32.gmra.mxu1 %vm1542_vm8, %v1481_v21 }
 0x178   : > { %1758 = vmatmul.f32.gmra.mxu2 %v1484_v19  ;;  %2312 = vmatmul.msk.f32.gmra.mxu3 %vm1542_vm8, %v1485_v36 }
 0x17f   : > { %1625 = vmatmul.f32.gmra.mxu0 %v1482_v15  ;;  %2295 = vmatmul.msk.f32.gmra.mxu1 %vm1542_vm8, %v1483_v48 }
 0x180   : > { %1761 = vmatmul.f32.gmra.mxu2 %v1486_v4  ;;  %2313 = vmatmul.msk.f32.gmra.mxu3 %vm1542_vm8, %v1487_v47 }
 0x187   : > { %1628 = vmatmul.f32.gmra.mxu0 %v1484_v19  ;;  %2296 = vmatmul.msk.f32.gmra.mxu1 %vm1542_vm8, %v1485_v36 }
 0x188   : > { %1764 = vmatmul.f32.gmra.mxu2 %v1488_v53  ;;  %2314 = vmatmul.msk.f32.gmra.mxu3 %vm1542_vm8, %v1489_v12 }
 0x18f   : > { %1631 = vmatmul.f32.gmra.mxu0 %v1486_v4  ;;  %2297 = vmatmul.msk.f32.gmra.mxu1 %vm1542_vm8, %v1487_v47 }
 0x190   : > { %1767 = vmatmul.f32.gmra.mxu2 %v1490_v3  ;;  %2315 = vmatmul.msk.f32.gmra.mxu3 %vm1542_vm8, %v1491_v9 }
 0x197   : > { %1634 = vmatmul.f32.gmra.mxu0 %v1488_v53  ;;  %2298 = vmatmul.msk.f32.gmra.mxu1 %vm1542_vm8, %v1489_v12 }
 0x198   : > { %1770 = vmatmul.f32.gmra.mxu2 %v1492_v27  ;;  %2316 = vmatmul.msk.f32.gmra.mxu3 %vm1542_vm8, %v1493_v38 }
 0x19f   : > { %1637 = vmatmul.f32.gmra.mxu0 %v1490_v3  ;;  %2299 = vmatmul.msk.f32.gmra.mxu1 %vm1542_vm8, %v1491_v9  ;;  %v2061_v9 = vld [vmem:[%s3759_s11 + $0xe0] sm:$0xff] }
 0x1a0   : > { %1773 = vmatmul.f32.gmra.mxu2 %v1494_v33  ;;  %2317 = vmatmul.msk.f32.gmra.mxu3 %vm1542_vm8, %v1495_v55 }
 0x1a1   : > { %2120 = vmatpush.msrb.mxu3 %v2061_v9 }
 0x1a7   : > { %1640 = vmatmul.f32.gmra.mxu0 %v1492_v27  ;;  %2300 = vmatmul.msk.f32.gmra.mxu1 %vm1542_vm8, %v1493_v38  ;;  %v2045_v27 = vld [vmem:[%s3759_s11 + $0x60] sm:$0xff] }
 0x1a8   : > { %1776 = vmatmul.f32.gmra.mxu2 %v1496_v58  ;;  %2318 = vmatmul.msk.f32.gmra.mxu3 %vm1542_vm8, %v1497_v29 }
 0x1a9   : > { %2100 = vmatpush.msrb.mxu1 %v2045_v27  ;;  %v2058_v27 = vld [vmem:[%s3759_s11 + $0xc8] sm:$0xff] }
 0x1ab   : > { %2101 = vmatpush.msrb.mxu1 %v2044_v34  ;;  %v2041_v34 = vld [vmem:[%s3759_s11 + $0x40] sm:$0xff] }
 0x1af   : > { %1643 = vmatmul.f32.gmra.mxu0 %v1494_v33  ;;  %2301 = vmatmul.msk.f32.gmra.mxu1 %vm1542_vm8, %v1495_v55 }
 0x1b0   : > { %1779 = vmatmul.f32.gmra.mxu2 %v1498_v1  ;;  %2319 = vmatmul.msk.f32.gmra.mxu3 %vm1542_vm8, %v1499_v13 }
 0x1b7   : > { %1646 = vmatmul.f32.gmra.mxu0 %v1496_v58  ;;  %2302 = vmatmul.msk.f32.gmra.mxu1 %vm1542_vm8, %v1497_v29 }
 0x1b8   : > { %1782 = vmatmul.f32.gmra.mxu2 %v1500_v61  ;;  %2320 = vmatmul.msk.f32.gmra.mxu3 %vm1542_vm8, %v1501_v28 }
 0x1bb   : > { %v1447_v56 = vpop.f32.mrf.mxu2  ;;  %v1467_v39 = vpop.f32.mrf.mxu3 }
 0x1bf   : > { %1649 = vmatmul.f32.gmra.mxu0 %v1498_v1  ;;  %2303 = vmatmul.msk.f32.gmra.mxu1 %vm1542_vm8, %v1499_v13 }
 0x1c3   : > { %v1738_v42 = vpop.f32.mrf.mxu2  ;;  %v1803_v20 = vpop.f32.mrf.mxu3 }
 0x1c4   : > { %v1375_v22 = vpop.f32.mrf.mxu0  ;;  %v1395_v52 = vpop.f32.mrf.mxu1  ;;  %v1804_v60 = vadd.f32 %v1803_v20, %v1738_v42 }
 0x1c5   : > { %v1396_v45 = vadd.f32 %v1395_v52, %v1375_v22 }
 0x1c6   : > { %v1858_v26 = vadd.f32 %v3558_v62, %v1804_v60 }
 0x1c7   : > { %v1448_v63 = vadd.f32 %v1447_v56, %v1396_v45  ;;  %1652 = vmatmul.f32.gmra.mxu0 %v1500_v61  ;;  %2304 = vmatmul.msk.f32.gmra.mxu1 %vm1542_vm8, %v1501_v28 }
 0x1c8   : > { %v1890_v31 = vmax.f32 %v1858_v26, 0.0 }
 0x1c9   : > { %v3560_v6 = vadd.f32 %v1467_v39, %v1448_v63  ;;  %v2060_v63 = vld [vmem:[%s3759_s11 + $0xd8] sm:$0xff] }
 0x1ca   : > { %2121 = vmatpush.msrb.mxu3 %v2060_v63  ;;  %v2057_v63 = vld [vmem:[%s3759_s11 + $0xc0] sm:$0xff] }
 0x1cb   : > { %v1741_v11 = vpop.f32.mrf.mxu2  ;;  %v1806_v8 = vpop.f32.mrf.mxu3 }
 0x1cc   : > { %v1608_v30 = vpop.f32.mrf.mxu0  ;;  %v1673_v41 = vpop.f32.mrf.mxu1  ;;  %v1807_v46 = vadd.f32 %v1806_v8, %v1741_v11 }
 0x1cd   : > { %v1674_v24 = vadd.f32 %v1673_v41, %v1608_v30 }
 0x1ce   : > { %v1860_v0 = vadd.f32 %v3558_v62, %v1807_v46 }
 0x1cf   : > { %v1857_v54 = vadd.f32 %v3570_v49, %v1674_v24 }
 0x1d0   : > { %v1892_v7 = vmax.f32 %v1860_v0, 0.0 }
 0x1d1   : > { %v1889_v16 = vmax.f32 %v1857_v54, 0.0 }
 0x1d2   : > { %v1928_v18 = vmax.f32 %v1890_v31, %v1892_v7 }
 0x1d3   : > { %v1744_v40 = vpop.f32.mrf.mxu2  ;;  %v1809_v25 = vpop.f32.mrf.mxu3 }
 0x1d4   : > { %v1611_v17 = vpop.f32.mrf.mxu0  ;;  %v1676_v44 = vpop.f32.mrf.mxu1  ;;  %v1810_v59 = vadd.f32 %v1809_v25, %v1744_v40  ;;  %v1929_v43 = vrot.slane %v1928_v18, 4 }
 0x1d5   : > { %v1677_v2 = vadd.f32 %v1676_v44, %v1611_v17  ;;  %v2059_v17 = vld [vmem:[%s3759_s11 + $0xd0] sm:$0xff] }
 0x1d6   : > { %v1862_v15 = vadd.f32 %v3558_v62, %v1810_v59  ;;  %v1930_v47 = vmax.f32 %v1928_v18, %v1929_v43  ;;  %v2043_v44 = vld [vmem:[%s3759_s11 + $0x50] sm:$0xff]  ;;  %2122 = vmatpush.msrb.mxu3 %v2059_v17 }
 0x1d7   : > { %v1859_v57 = vadd.f32 %v3570_v49, %v1677_v2  ;;  %2102 = vmatpush.msrb.mxu1 %v2043_v44 }
 0x1d8   : > { %v1894_v12 = vmax.f32 %v1862_v15, 0.0  ;;  %v1931_v38 = vrot.slane %v1930_v47, 2  ;;  %2123 = vmatpush.msrb.mxu3 %v2058_v27 }
 0x1d9   : > { %v1891_v5 = vmax.f32 %v1859_v57, 0.0 }
 0x1da   : > { %v1932_v42 = vmax.f32 %v1930_v47, %v1931_v38  ;;  %v2042_v38 = vld [vmem:[%s3759_s11 + $0x48] sm:$0xff]  ;;  %2124 = vmatpush.msrb.mxu3 %v2057_v63 }
 0x1db   : > { %v1921_v37 = vmax.f32 %v1889_v16, %v1891_v5  ;;  %v1747_v14 = vpop.f32.mrf.mxu2  ;;  %v1812_v21 = vpop.f32.mrf.mxu3  ;;  %2103 = vmatpush.msrb.mxu1 %v2042_v38 }
 0x1dc   : > { %v1614_v48 = vpop.f32.mrf.mxu0  ;;  %v1679_v19 = vpop.f32.mrf.mxu1  ;;  %v1813_v36 = vadd.f32 %v1812_v21, %v1747_v14  ;;  %v1933_v51 = vrot.slane %v1932_v42, 1 }
 0x1dd   : > { %v1680_v4 = vadd.f32 %v1679_v19, %v1614_v48  ;;  %v1922_v55 = vrot.slane %v1921_v37, 4  ;;  %2104 = vmatpush.msrb.mxu1 %v2041_v34 }
 0x1de   : > { %v1864_v53 = vadd.f32 %v3558_v62, %v1813_v36  ;;  %v1934_v18 = vmax.f32 %v1932_v42, %v1933_v51 }
 0x1df   : > { %v1861_v56 = vadd.f32 %v3570_v49, %v1680_v4  ;;  %v1923_v22 = vmax.f32 %v1921_v37, %v1922_v55 }
 0x1e0   : > { %v1896_v3 = vmax.f32 %v1864_v53, 0.0 }
 0x1e1   : > { %v1893_v45 = vmax.f32 %v1861_v56, 0.0  ;;  %v1924_v8 = vrot.slane %v1923_v22, 2 }
 0x1e2   : > { %v1942_v33 = vmax.f32 %v1894_v12, %v1896_v3 }
 0x1e3   : > { %v1750_v58 = vpop.f32.mrf.mxu2  ;;  %v1815_v29 = vpop.f32.mrf.mxu3  ;;  %v1925_v59 = vmax.f32 %v1923_v22, %v1924_v8 }
 0x1e4   : > { %v1943_v1 = vrot.slane %v1942_v33, 4  ;;  %v1617_v13 = vpop.f32.mrf.mxu0  ;;  %v1682_v61 = vpop.f32.mrf.mxu1  ;;  %v1816_v28 = vadd.f32 %v1815_v29, %v1750_v58 }
 0x1e5   : > { %v1683_v39 = vadd.f32 %v1682_v61, %v1617_v13  ;;  %v1926_v35 = vrot.slane %v1925_v59, 1 }
 0x1e6   : > { %v1944_v20 = vmax.f32 %v1942_v33, %v1943_v1  ;;  %v1866_v24 = vadd.f32 %v3558_v62, %v1816_v28 }
 0x1e7   : > { %v1863_v52 = vadd.f32 %v3570_v49, %v1683_v39  ;;  %v1927_v12 = vmax.f32 %v1925_v59, %v1926_v35  ;;  %v2056_v59 = vld [vmem:[%s3759_s11 + $0xb8] sm:$0xff] }
 0x1e8   : > { %v1945_v60 = vrot.slane %v1944_v20, 2  ;;  %v1898_v57 = vmax.f32 %v1866_v24, 0.0  ;;  %2125 = vmatpush.msrb.mxu3 %v2056_v59 }
 0x1e9   : > { %v1895_v32 = vmax.f32 %v1863_v52, 0.0 }
 0x1ea   : > { %v1946_v11 = vmax.f32 %v1944_v20, %v1945_v60 }
 0x1eb   : > { %v1935_v26 = vmax.f32 %v1893_v45, %v1895_v32  ;;  %v1753_v30 = vpop.f32.mrf.mxu2  ;;  %v1818_v41 = vpop.f32.mrf.mxu3 }
 0x1ec   : > { %v1947_v46 = vrot.slane %v1946_v11, 1  ;;  %v1620_v0 = vpop.f32.mrf.mxu0  ;;  %v1685_v31 = vpop.f32.mrf.mxu1  ;;  %v1819_v7 = vadd.f32 %v1818_v41, %v1753_v30 }
 0x1ed   : > { %v1936_v10 = vrot.slane %v1935_v26, 4  ;;  %v1686_v23 = vadd.f32 %v1685_v31, %v1620_v0 }
 0x1ee   : > { %v1948_v40 = vmax.f32 %v1946_v11, %v1947_v46  ;;  %v1868_v25 = vadd.f32 %v3558_v62, %v1819_v7 }
 0x1ef   : > { %v1937_v54 = vmax.f32 %v1935_v26, %v1936_v10  ;;  %v1865_v4 = vadd.f32 %v3570_v49, %v1686_v23 }
 0x1f0   : > { %v2088_v2 = vsel %vm1335_vm1, %v1948_v40, %v1934_v18  ;;  %v1900_v16 = vmax.f32 %v1868_v25, 0.0 }
 0x1f1   : > { %v1938_v5 = vrot.slane %v1937_v54, 2  ;;  %v1897_v58 = vmax.f32 %v1865_v4, 0.0  ;;  %v2039_v4 = vld [vmem:[%s3759_s11 + $0x30] sm:$0xff] }
 0x1f2   : > { %v1956_v50 = vmax.f32 %v1898_v57, %v1900_v16 }
 0x1f3   : > { %v1939_v43 = vmax.f32 %v1937_v54, %v1938_v5  ;;  %v1756_v37 = vpop.f32.mrf.mxu2  ;;  %v1821_v14 = vpop.f32.mrf.mxu3  ;;  %v2040_v54 = vld [vmem:[%s3759_s11 + $0x38] sm:$0xff] }
 0x1f4   : > { %v1957_v21 = vrot.slane %v1956_v50, 4  ;;  %v1623_v15 = vpop.f32.mrf.mxu0  ;;  %v1688_v48 = vpop.f32.mrf.mxu1  ;;  %v1822_v19 = vadd.f32 %v1821_v14, %v1756_v37  ;;  %2105 = vmatpush.msrb.mxu1 %v2040_v54 }
 0x1f5   : > { %v1940_v36 = vrot.slane %v1939_v43, 1  ;;  %v1689_v47 = vadd.f32 %v1688_v48, %v1623_v15 }
 0x1f6   : > { %v1958_v53 = vmax.f32 %v1956_v50, %v1957_v21  ;;  %v1870_v39 = vadd.f32 %v3558_v62, %v1822_v19  ;;  %2106 = vmatpush.msrb.mxu1 %v2039_v4 }
 0x1f7   : > { %v1941_v3 = vmax.f32 %v1939_v43, %v1940_v36  ;;  %v1867_v9 = vadd.f32 %v3570_v49, %v1689_v47  ;;  %v2055_v36 = vld [vmem:[%s3759_s11 + $0xb0] sm:$0xff] }
 0x1f8   : > { %v1959_v33 = vrot.slane %v1958_v53, 2  ;;  %v1902_v8 = vmax.f32 %v1870_v39, 0.0  ;;  %2126 = vmatpush.msrb.mxu3 %v2055_v36 }
 0x1f9   : > { %v2081_v55 = vsel %vm1335_vm1, %v1941_v3, %v1927_v12  ;;  %v1899_v29 = vmax.f32 %v1867_v9, 0.0 }
 0x1fa   : > { %v1960_v1 = vmax.f32 %v1958_v53, %v1959_v33 }
 0x1fb   : > { %v1949_v13 = vmax.f32 %v1897_v58, %v1899_v29  ;;  %v1759_v61 = vpop.f32.mrf.mxu2  ;;  %v1824_v28 = vpop.f32.mrf.mxu3  ;;  %v2054_v29 = vld [vmem:[%s3759_s11 + $0xa8] sm:$0xff] }
 0x1fc   : > { %v1961_v56 = vrot.slane %v1960_v1, 1  ;;  %v1626_v42 = vpop.f32.mrf.mxu0  ;;  %v1691_v20 = vpop.f32.mrf.mxu1  ;;  %v1825_v22 = vadd.f32 %v1824_v28, %v1759_v61  ;;  %2127 = vmatpush.msrb.mxu3 %v2054_v29  ;;  %v2033_v29 = vld [vmem:[%s3759_s11] sm:$0xff] }
 0x1fd   : > { %v1950_v52 = vrot.slane %v1949_v13, 4  ;;  %v1692_v60 = vadd.f32 %v1691_v20, %v1626_v42  ;;  %v2053_v42 = vld [vmem:[%s3759_s11 + $0xa0] sm:$0xff] }
 0x1fe   : > { %v1962_v45 = vmax.f32 %v1960_v1, %v1961_v56  ;;  %v1872_v32 = vadd.f32 %v3558_v62, %v1825_v22  ;;  %v2038_v1 = vld [vmem:[%s3759_s11 + $0x28] sm:$0xff]  ;;  %v2037_v20 = vld [vmem:[%s3759_s11 + $0x20] sm:$0xff]  ;;  %2128 = vmatpush.msrb.mxu3 %v2053_v42 }
 0x1ff   : > { %v1951_v51 = vmax.f32 %v1949_v13, %v1950_v52  ;;  %v1869_v18 = vadd.f32 %v3570_v49, %v1692_v60  ;;  %2107 = vmatpush.msrb.mxu1 %v2038_v1 }
 0x200   : > { %v2089_v11 = vsel %vm1337_vm2, %v1962_v45, %v2088_v2  ;;  %v1904_v26 = vmax.f32 %v1872_v32, 0.0 }
 0x201   : > { %v1952_v30 = vrot.slane %v1951_v51, 2  ;;  %v1901_v16 = vmax.f32 %v1869_v18, 0.0  ;;  %2108 = vmatpush.msrb.mxu1 %v2037_v20  ;;  %v2051_v18 = vld [vmem:[%s3759_s11 + $0x90] sm:$0xff] }
 0x202   : > { %v1970_v41 = vmax.f32 %v1902_v8, %v1904_v26 }
 0x203   : > { %v1953_v46 = vmax.f32 %v1951_v51, %v1952_v30  ;;  %v1762_v24 = vpop.f32.mrf.mxu2  ;;  %v1827_v0 = vpop.f32.mrf.mxu3  ;;  %v2052_v51 = vld [vmem:[%s3759_s11 + $0x98] sm:$0xff] }
 0x204   : > { %v1971_v31 = vrot.slane %v1970_v41, 4  ;;  %v1629_v7 = vpop.f32.mrf.mxu0  ;;  %v1694_v10 = vpop.f32.mrf.mxu1  ;;  %v1828_v34 = vadd.f32 %v1827_v0, %v1762_v24  ;;  %2129 = vmatpush.msrb.mxu3 %v2052_v51 }
 0x205   : > { %v1954_v23 = vrot.slane %v1953_v46, 1  ;;  %v1695_v40 = vadd.f32 %v1694_v10, %v1629_v7 }
 0x206   : > { %v1972_v25 = vmax.f32 %v1970_v41, %v1971_v31  ;;  %2130 = vmatpush.msrb.mxu3 %v2051_v18 }
 0x207   : > { %v1955_v17 = vmax.f32 %v1953_v46, %v1954_v23  ;;  %v1871_v44 = vadd.f32 %v3570_v49, %v1695_v40  ;;  %v1874_v46 = vadd.f32 %v3558_v62, %v1828_v34  ;;  %v2035_v40 = vld [vmem:[%s3759_s11 + $0x10] sm:$0xff] }
 0x208   : > { %v1973_v2 = vrot.slane %v1972_v25, 2 }
 0x209   : > { %v2082_v57 = vsel %vm1337_vm2, %v1955_v17, %v2081_v55  ;;  %v1903_v5 = vmax.f32 %v1871_v44, 0.0 }
 0x20a   : > { %v1974_v50 = vmax.f32 %v1972_v25, %v1973_v2  ;;  %v2050_v2 = vld [vmem:[%s3759_s11 + $0x88] sm:$0xff] }
 0x20b   : > { %v1963_v35 = vmax.f32 %v1901_v16, %v1903_v5  ;;  %v1765_v43 = vpop.f32.mrf.mxu2  ;;  %v1830_v37 = vpop.f32.mrf.mxu3  ;;  %2131 = vmatpush.msrb.mxu3 %v2050_v2 }
 0x20c   : > { %v1975_v14 = vrot.slane %v1974_v50, 1  ;;  %v3632_v21 = vpop.f32.mrf.mxu0  ;;  %v3634_v15 = vpop.f32.mrf.mxu1  ;;  %v1831_v32 = vadd.f32 %v1830_v37, %v1765_v43  ;;  %v2049_v43 = vld [vmem:[%s3759_s11 + $0x80] sm:$0xff] }
 0x20d   : > { %v1964_v48 = vrot.slane %v1963_v35, 4  ;;  %v1698_v5 = vadd.f32 %v3634_v15, %v3632_v21  ;;  %2132 = vmatpush.msrb.mxu3 %v2049_v43 }
 0x20e   : > { %v1976_v19 = vmax.f32 %v1974_v50, %v1975_v14  ;;  %v1876_v26 = vadd.f32 %v3558_v62, %v1831_v32 }
 0x20f   : > { %v1965_v47 = vmax.f32 %v1963_v35, %v1964_v48  ;;  %v1873_v21 = vadd.f32 %v3570_v49, %v1698_v5 }
 0x210   : > { %v3643_v53 = vsel %vm1339_vm3, %v1976_v19, %v2089_v11  ;;  %v2036_v11 = vld [vmem:[%s3759_s11 + $0x18] sm:$0xff]  ;;  %v1908_v25 = vmax.f32 %v1876_v26, 0.0 }
 0x211   : > { %v1966_v12 = vrot.slane %v1965_v47, 2  ;;  %2109 = vmatpush.msrb.mxu1 %v2036_v11  ;;  %v1905_v20 = vmax.f32 %v1873_v21, 0.0 }
 0x213   : > { %v1967_v3 = vmax.f32 %v1965_v47, %v1966_v12  ;;  %v1768_v9 = vpop.f32.mrf.mxu2  ;;  %v1833_v27 = vpop.f32.mrf.mxu3  ;;  %2110 = vmatpush.msrb.mxu1 %v2035_v40 }
 0x214   : > { %v1635_v38 = vpop.f32.mrf.mxu0  ;;  %v1700_v33 = vpop.f32.mrf.mxu1  ;;  %v1834_v8 = vadd.f32 %v1833_v27, %v1768_v9 }
 0x215   : > { %v1968_v55 = vrot.slane %v1967_v3, 1  ;;  %v1701_v44 = vadd.f32 %v1700_v33, %v1635_v38 }
 0x216   : > { %v1878_v0 = vadd.f32 %v3558_v62, %v1834_v8 }
 0x217   : > { %v1969_v58 = vmax.f32 %v1967_v3, %v1968_v55  ;;  %v1875_v19 = vadd.f32 %v3570_v49, %v1701_v44 }
 0x218   : > { %v1910_v50 = vmax.f32 %v1878_v0, 0.0 }
 0x219   : > { %v3652_v13 = vsel %vm1339_vm3, %v1969_v58, %v2082_v57  ;;  %v1906_v57 = vmax.f32 %v1874_v46, 0.0  ;;  %v2034_v58 = vld [vmem:[%s3759_s11 + $0x8] sm:$0xff]  ;;  %v1907_v1 = vmax.f32 %v1875_v19, 0.0 }
 0x21a   : > { %2111 = vmatpush.msrb.mxu1 %v2034_v58 }
 0x21b   : > { %v1771_v61 = vpop.f32.mrf.mxu2  ;;  %v1836_v28 = vpop.f32.mrf.mxu3  ;;  %v1984_v37 = vmax.f32 %v1906_v57, %v1908_v25  ;;  %v1977_v32 = vmax.f32 %v1905_v20, %v1907_v1 }
 0x21c   : > { %v1638_v56 = vpop.f32.mrf.mxu0  ;;  %v1703_v39 = vpop.f32.mrf.mxu1  ;;  %v1837_v63 = vadd.f32 %v1836_v28, %v1771_v61  ;;  %2112 = vmatpush.msrb.mxu1 %v2033_v29 }
 0x21d   : > { %v1704_v14 = vadd.f32 %v1703_v39, %v1638_v56  ;;  %v1985_v38 = vrot.slane %v1984_v37, 4 }
 0x21e   : > { %v1880_v41 = vadd.f32 %v3558_v62, %v1837_v63 }
 0x21f   : > { %v1877_v33 = vadd.f32 %v3570_v49, %v1704_v14 }
 0x220   : > { %v1912_v59 = vmax.f32 %v1880_v41, 0.0 }
 0x222   : > { %v1998_v36 = vmax.f32 %v1910_v50, %v1912_v59 }
 0x223   : > { %v1774_v22 = vpop.f32.mrf.mxu2  ;;  %v1839_v52 = vpop.f32.mrf.mxu3 }
 0x224   : > { %v1641_v60 = vpop.f32.mrf.mxu0  ;;  %v1706_v45 = vpop.f32.mrf.mxu1  ;;  %v1840_v30 = vadd.f32 %v1839_v52, %v1774_v22  ;;  %v1999_v61 = vrot.slane %v1998_v36, 4  ;;  %v1986_v52 = vmax.f32 %v1984_v37, %v1985_v38 }
 0x225   : > { %v1707_v16 = vadd.f32 %v1706_v45, %v1641_v60  ;;  %v1909_v60 = vmax.f32 %v1877_v33, 0.0 }
 0x226   : > { %v1882_v17 = vadd.f32 %v3558_v62, %v1840_v30  ;;  %v2000_v63 = vmax.f32 %v1998_v36, %v1999_v61  ;;  %v1987_v0 = vrot.slane %v1986_v52, 2 }
 0x227   : > { %v1879_v47 = vadd.f32 %v3570_v49, %v1707_v16 }
 0x228   : > { %v1914_v48 = vmax.f32 %v1882_v17, 0.0  ;;  %v1988_v59 = vmax.f32 %v1986_v52, %v1987_v0 }
 0x229   : > { %v1911_v56 = vmax.f32 %v1879_v47, 0.0 }
 0x22b   : > { %v1777_v31 = vpop.f32.mrf.mxu2  ;;  %v1842_v24 = vpop.f32.mrf.mxu3  ;;  %v1991_v51 = vmax.f32 %v1909_v60, %v1911_v56 }
 0x22c   : > { %v1644_v7 = vpop.f32.mrf.mxu0  ;;  %v1709_v10 = vpop.f32.mrf.mxu1  ;;  %v1843_v23 = vadd.f32 %v1842_v24, %v1777_v31 }
 0x22d   : > { %v1710_v4 = vadd.f32 %v1709_v10, %v1644_v7  ;;  %v1978_v7 = vrot.slane %v1977_v32, 4  ;;  %v2001_v10 = vrot.slane %v2000_v63, 2  ;;  %v1992_v18 = vrot.slane %v1991_v51, 4 }
 0x22e   : > { %v1884_v54 = vadd.f32 %v3558_v62, %v1843_v23 }
 0x22f   : > { %v1881_v28 = vadd.f32 %v3570_v49, %v1710_v4  ;;  %v1979_v2 = vmax.f32 %v1977_v32, %v1978_v7  ;;  %v2002_v57 = vmax.f32 %v2000_v63, %v2001_v10  ;;  %v1993_v5 = vmax.f32 %v1991_v51, %v1992_v18 }
 0x230   : > { %v1916_v35 = vmax.f32 %v1884_v54, 0.0 }
 0x231   : > { %v1913_v34 = vmax.f32 %v1881_v28, 0.0  ;;  %v1980_v36 = vrot.slane %v1979_v2, 2  ;;  %v2003_v4 = vrot.slane %v2002_v57, 1 }
 0x232   : > { %v2012_v12 = vmax.f32 %v1914_v48, %v1916_v35  ;;  %v1989_v48 = vrot.slane %v1988_v59, 1 }
 0x233   : > { %v1780_v3 = vpop.f32.mrf.mxu2  ;;  %v1845_v9 = vpop.f32.mrf.mxu3  ;;  %v2004_v58 = vmax.f32 %v2002_v57, %v2003_v4 }
 0x234   : > { %v1647_v15 = vpop.f32.mrf.mxu0  ;;  %v1712_v27 = vpop.f32.mrf.mxu1  ;;  %v2013_v39 = vrot.slane %v2012_v12, 4  ;;  %v1846_v22 = vadd.f32 %v1845_v9, %v1780_v3 }
 0x235   : > { %v1713_v55 = vadd.f32 %v1712_v27, %v1647_v15  ;;  %v1990_v27 = vmax.f32 %v1988_v59, %v1989_v48 }
 0x236   : > { %v2014_v11 = vmax.f32 %v2012_v12, %v2013_v39  ;;  %v1886_v41 = vadd.f32 %v3558_v62, %v1846_v22  ;;  %v1994_v12 = vrot.slane %v1993_v5, 2 }
 0x237   : > { %v1883_v42 = vadd.f32 %v3570_v49, %v1713_v55  ;;  %v1981_v55 = vmax.f32 %v1979_v2, %v1980_v36  ;;  %v2091_v20 = vsel %vm1341_vm4, %v1990_v27, %v3643_v53 }
 0x238   : > { %v2015_v40 = vrot.slane %v2014_v11, 2  ;;  %v1918_v17 = vmax.f32 %v1886_v41, 0.0  ;;  %v1995_v1 = vmax.f32 %v1993_v5, %v1994_v12 }
 0x239   : > { %v1915_v45 = vmax.f32 %v1883_v42, 0.0  ;;  %v1982_v22 = vrot.slane %v1981_v55, 1 }
 0x23a   : > { %v2016_v50 = vmax.f32 %v2014_v11, %v2015_v40  ;;  %v1996_v60 = vrot.slane %v1995_v1, 1 }
 0x23b   : > { %v1783_v8 = vpop.f32.mrf.mxu2  ;;  %v1848_v26 = vpop.f32.mrf.mxu3  ;;  %v2005_v30 = vmax.f32 %v1913_v34, %v1915_v45  ;;  %v1983_v11 = vmax.f32 %v1981_v55, %v1982_v22 }
 0x23c   : > { %v1650_v46 = vpop.f32.mrf.mxu0  ;;  %v1715_v31 = vpop.f32.mrf.mxu1  ;;  %v1849_v24 = vadd.f32 %v1848_v26, %v1783_v8  ;;  %v2017_v3 = vrot.slane %v2016_v50, 1  ;;  %v1997_v8 = vmax.f32 %v1995_v1, %v1996_v60 }
 0x23d   : > { %v2006_v25 = vrot.slane %v2005_v30, 4  ;;  %v1716_v54 = vadd.f32 %v1715_v31, %v1650_v46  ;;  %v2084_v41 = vsel %vm1341_vm4, %v1983_v11, %v3652_v13  ;;  %v2367_v13 = vld [vmem:[%s3760_s12] ss:$0 sm:$0xff] }
 0x23e   : > { %v1888_v23 = vadd.f32 %v3558_v62, %v1849_v24  ;;  %v2018_v61 = vmax.f32 %v2016_v50, %v2017_v3  ;;  %v2085_v31 = vsel %vm1343_vm5, %v1997_v8, %v2084_v41 }
 0x23f   : > { %v2007_v35 = vmax.f32 %v2005_v30, %v2006_v25  ;;  %v1885_v19 = vadd.f32 %v3570_v49, %v1716_v54 }
 0x240   : > { %v1920_v44 = vmax.f32 %v1888_v23, 0.0 }
 0x241   : > { %v2008_v21 = vrot.slane %v2007_v35, 2  ;;  %v1917_v38 = vmax.f32 %v1885_v19, 0.0 }
 0x242   : > { %v2026_v16 = vmax.f32 %v1918_v17, %v1920_v44 }
 0x243   : > { %v2009_v56 = vmax.f32 %v2007_v35, %v2008_v21 }
 0x244   : > { %v2027_v43 = vrot.slane %v2026_v16, 4  ;;  %v1653_v37 = vpop.f32.mrf.mxu0  ;;  %v1718_v14 = vpop.f32.mrf.mxu1 }
 0x245   : > { %v1719_v62 = vadd.f32 %v1718_v14, %v1653_v37  ;;  %v2010_v63 = vrot.slane %v2009_v56, 1 }
 0x246   : > { %v2028_v47 = vmax.f32 %v2026_v16, %v2027_v43 }
 0x247   : > { %v1887_v9 = vadd.f32 %v3570_v49, %v1719_v62  ;;  %v2092_v49 = vsel %vm1343_vm5, %v2004_v58, %v2091_v20  ;;  %v2011_v30 = vmax.f32 %v2009_v56, %v2010_v63 }
 0x248   : > { %v2029_v15 = vrot.slane %v2028_v47, 2  ;;  %v2093_v32 = vsel %vm1345_vm6, %v2018_v61, %v2092_v49 }
 0x249   : > { %v1919_v33 = vmax.f32 %v1887_v9, 0.0  ;;  %v2086_v24 = vsel %vm1345_vm6, %v2011_v30, %v2085_v31 }
 0x24a   : > { %v2030_v29 = vmax.f32 %v2028_v47, %v2029_v15 }
 0x24b   : > { %v2019_v28 = vmax.f32 %v1917_v38, %v1919_v33 }
 0x24c   : > { %v2031_v39 = vrot.slane %v2030_v29, 1 }
 0x24d   : > { %v2020_v42 = vrot.slane %v2019_v28, 4 }
 0x24e   : > { %v2032_v52 = vmax.f32 %v2030_v29, %v2031_v39 }
 0x24f   : > { %v2021_v45 = vmax.f32 %v2019_v28, %v2020_v42 }
 0x250   : > { %v2094_v34 = vsel %vm1347_vm7, %v2032_v52, %v2093_v32 }
 0x251   : > { %v2022_v51 = vrot.slane %v2021_v45, 2  ;;  %2133 = vmatmul.f32.vlgmr.msrb.gmra.mxu3 %v2094_v34 }
 0x253   : > { %v2023_v26 = vmax.f32 %v2021_v45, %v2022_v51 }
 0x255   : > { %v2024_v53 = vrot.slane %v2023_v26, 1 }
 0x257   : > { %v2025_v46 = vmax.f32 %v2023_v26, %v2024_v53 }
 0x259   : > { %v2087_v0 = vsel %vm1347_vm7, %v2025_v46, %v2086_v24 }
 0x25a   : > { %2113 = vmatmul.f32.vlgmr.msrb.gmra.mxu1 %v2087_v0 }
 0x2d4   : > { %v2134_v7 = vpop.f32.mrf.mxu3 }
 0x2d7   : > { %v2114_v10 = vpop.f32.mrf.mxu1 }
 0x2d8   : > { %v2135_v23 = vadd.f32 %v2134_v7, %v2114_v10 }
 0x2da   : > { %v2137_v18 = vadd.f32 %v2135_v23, %v3560_v6 }
 0x2dc   : > { %v2142_v40 = vadd.f32 %v2367_v13, %v2137_v18 }
 0x2de   : > { %2143 = vst [vmem:[%s472_s14] sm:$0xff] %v2142_v40 }
 0x2df   : > { %2395 = shalt.err (!%p2392_p3)
}
 0x2e0   : > { %2328 = dma.vmem_to_hbm [thread:$0]  (%p2539_p5), %s2158_s19, 128, %s2160_s27, %s2145_s17  }
 0x2e1 PF: > { %p2334_p4 = scmp.ge.s32.totalorder %s2430_s28, 2  ;;  %s2171_s29 = sand.u32 1, %s2418_s25  }
 0x2e2   : > { %s2172_s14 = scalar_lea.sflag [#allocation3], %s2171_s29 }
 0x2e3   : > { %p2331_p7 = pnand %p2334_p4, %p2543_p6 }
 0x2e5   : > { %p2332_p8 = pneg %p2331_p7 }
 0x2e7   : > { %2413 = dma.done.wait (%p2332_p8), %s2172_s14, 128  }
 0x2e8   : > { %2415 = vsyncadd (%p2332_p8), %s2172_s14, 4294967168  ;;  %s3777_s28 = sld [smem:[#allocation6_spill]]  ;;  %s3780_s25 = smov %s2422_s26 }
 0x2e9   : > { %s3778_s20 = sld [smem:[#allocation5_spill]] }
 0x2ea   : > { %s3779_s27 = sld [smem:[#allocation7_spill]] }
 0x2ee   : > { %p23_p9 = scmp.ge.s32.totalorder %s3777_s28, 4  }
 0x2ef   : > { %s3781_s26 = smov %s3778_s20 }
 0x2f0   :  { %25 = sbr.rel (!%p23_p9) target bundleno = 3 (0x3), region = 113 }
 0x2f5   :  { %2178 = vsyncpa [#allocation3], 1 }
 0x2f6   :  { %2180 = vsyncpa [#allocation3 + $0x1], 1 }

</bundles_post_ra>
